<compile_context>
chip_gen: v7x
topology: tpu7x:2x2x1
jax: 0.10.0
libtpu: 0.0.40
codegen_flags: <defaults>
</compile_context>

<pallas_src>
import functools

import jax
import jax.numpy as jnp
from jax import lax
from jax.experimental import pallas as pl
from jax.experimental.pallas import tpu as pltpu


def _round_up(x, m):
    return (x + m - 1) // m * m


# -----------------------------------------------------------------------------
# Kernel: fused conv block
#   im2col over taps -> single MXU matmul -> bias -> (BN stats | ReLU -> H-pool
#   -> optional fused W-pool/crop)
# -----------------------------------------------------------------------------
def _conv_block_kernel(x_ref, w_ref, b_ref, *out_refs, ksize, ho, wo, wp8, bn, pool):
    """x_ref: (1, rx, cin) band layout (flat row = h*wp8 + w), already im2col'ed
    for ksize==1.  w_ref: (k*k*cin, cout).  b_ref: (1, cout)."""
    o_ref = out_refs[0]
    cout = w_ref.shape[-1]
    m = ho * wp8

    # im2col the k*k taps along the contraction (lane) dim -> ONE matmul.
    if ksize == 1:
        rows_cat = x_ref[0]                                   # (m, k*k*cin) ready
    else:
        parts = []
        for dh in range(ksize):
            for dw in range(ksize):
                start = dh * wp8 + dw                         # static offset
                parts.append(x_ref[0, start:start + m, :])    # (m, cin)
        rows_cat = jnp.concatenate(parts, axis=1)             # (m, k*k*cin)

    y = jnp.dot(rows_cat, w_ref[...], preferred_element_type=jnp.float32)
    y = y + b_ref[...]                                        # (m, cout) f32

    if bn:
        # Raw (pre-BN) output + per-sample batch statistics over valid columns.
        y3 = y.reshape(ho, wp8, cout)
        yv = y3[:, :wo, :]
        out_refs[1][...] = jnp.sum(yv, axis=(0, 1), keepdims=True)
        out_refs[2][...] = jnp.sum(yv * yv, axis=(0, 1), keepdims=True)
        o_ref[0] = y3
        return

    y = jnp.maximum(y, 0.0)                                   # ReLU

    if pool is None:
        o_ref[0] = y.reshape(ho, wp8, cout)
        return

    # H-direction maxpool (kernel 2, stride 2): pair rows wp8 apart via a free
    # leading-dim reshape + aligned sublane slices.
    ho2 = ho // 2
    m2 = ho2 * wp8
    v = y.reshape(ho2, 2 * wp8, cout)
    yh = jnp.maximum(v[:, :wp8, :], v[:, wp8:, :])            # (ho2, wp8, cout)

    if pool == "s2":
        # W kernel 2, stride 2: pair-max here; even-column decimation in wrapper.
        flat = yh.reshape(m2, cout)
        nxt = jnp.concatenate(
            [flat[1:, :], jnp.zeros((1, cout), flat.dtype)], axis=0)
        o_ref[0] = jnp.maximum(flat, nxt).reshape(ho2, wp8, cout)
    else:
        # "s1": W kernel 2, stride 1, pad 1.  Inputs are >= 0 (post-ReLU), so
        # 0-padding is equivalent to -inf padding for the max; garbage columns
        # (>= wo) are zeroed before the shift so wrapped values never win.
        col = lax.broadcasted_iota(jnp.int32, (ho2, wp8, 1), 1)
        masked = jnp.where(col < wo, yh, 0.0).reshape(m2, cout)
        prev = jnp.concatenate(
            [jnp.zeros((1, cout), masked.dtype), masked[:m2 - 1, :]], axis=0)
        pooled = jnp.maximum(masked, prev).reshape(ho2, wp8, cout)
        o_ref[0] = pooled[:, :wo + 1, :]                      # crop fused in-kernel


def conv_block(x_nhwc, p, pool):
    """pool: None | 's2' (2x2 stride 2) | 's1' (2x2 stride (2,1) pad (0,1))."""
    n, h, w, cin = x_nhwc.shape
    k, pad, bn = p["k"], p["pad"], p["bn"]
    cout = p["pw_w"].shape[1]
    ho = h + 2 * pad - k + 1
    wo = w + 2 * pad - k + 1
    hp, wp = h + 2 * pad, w + 2 * pad
    wp8 = _round_up(wp, 8)
    m = ho * wp8

    # Fold depthwise + pointwise into one (k*k*cin, cout) MXU weight (+ fused bias).
    mx_dtype = jnp.float32 if cin == 1 else jnp.bfloat16
    w_cat = (p["dw_w"][:, :, :, None] * p["pw_w"][None, None, :, :]
             ).reshape(k * k * cin, cout).astype(mx_dtype)
    b_fused = (p["dw_b"] @ p["pw_w"] + p["pw_b"]).astype(jnp.float32)   # (1, cout)

    # Padded, 8-aligned "band" layout (flat row = h*wp8 + w), +1 zero safety band.
    xpad = jnp.pad(x_nhwc, ((0, 0), (pad, pad + 1), (pad, pad + (wp8 - wp)), (0, 0)))
    if cin == 1:
        # Layer 0: build the tiny (m, k*k) im2col in XLA so the kernel runs a
        # single MXU matmul instead of a lane-width-1 VPU broadcast chain.
        xflat = xpad.reshape(n, (hp + 1) * wp8)
        cols = [xflat[:, dh * wp8 + dw: dh * wp8 + dw + m]
                for dh in range(k) for dw in range(k)]
        xin = jnp.stack(cols, axis=-1).astype(mx_dtype)        # (n, m, k*k)
        k_eff, cin_eff, rx = 1, k * k, m
    else:
        rx = (hp + 1) * wp8
        xin = xpad.reshape(n, rx, cin).astype(mx_dtype)
        k_eff, cin_eff = k, cin

    if bn:
        ho_out, wo_out = ho, wp8
    elif pool == "s2":
        ho_out, wo_out = ho // 2, wp8
    elif pool == "s1":
        ho_out, wo_out = ho // 2, wo + 1
    else:
        ho_out, wo_out = ho, wp8

    out_shapes = [jax.ShapeDtypeStruct((n, ho_out, wo_out, cout), jnp.float32)]
    out_specs = [pl.BlockSpec((1, ho_out, wo_out, cout), lambda i: (i, 0, 0, 0))]
    if bn:
        out_shapes += [jax.ShapeDtypeStruct((n, 1, cout), jnp.float32)] * 2
        out_specs += [pl.BlockSpec((1, 1, cout), lambda i: (i, 0, 0))] * 2

    kernel = functools.partial(_conv_block_kernel, ksize=k_eff, ho=ho, wo=wo,
                               wp8=wp8, bn=bn, pool=pool)

    res = pl.pallas_call(
        kernel,
        out_shape=tuple(out_shapes),
        grid=(n,),
        in_specs=[
            pl.BlockSpec((1, rx, cin_eff), lambda i: (i, 0, 0)),
            pl.BlockSpec((k_eff * k_eff * cin_eff, cout), lambda i: (0, 0)),
            pl.BlockSpec((1, cout), lambda i: (0, 0)),
        ],
        out_specs=tuple(out_specs),
        compiler_params=pltpu.CompilerParams(
            dimension_semantics=("parallel",),
            vmem_limit_bytes=32 * 1024 * 1024),
    )(xin, w_cat, b_fused)

    band = res[0]

    if bn:
        # Training-mode BatchNorm from per-sample partial sums emitted in-kernel.
        ssum = jnp.sum(res[1], axis=0)[0]                      # (cout,)
        ssq = jnp.sum(res[2], axis=0)[0]
        cnt = float(n * ho * wo)
        mean = ssum / cnt
        # NOTE: E[x^2]-E[x]^2 in f32; fine at these activation magnitudes.
        var = jnp.maximum(ssq / cnt - mean * mean, 0.0)
        scale = p["gamma"] / jnp.sqrt(var + 1e-5)
        shift = p["beta"] - mean * scale
        return affine_relu_crop(band, scale, shift, wo)

    if pool == "s2":
        # TODO(synk): the stride-2 W decimation stays as one XLA strided slice
        # (a sublane-strided gather has no cheap Mosaic-native form at this layout).
        return band[:, :, 0:wo:2, :]
    if pool == "s1":
        return band                                            # cropped in-kernel
    return band[:, :, :wo, :]


# -----------------------------------------------------------------------------
# Kernel: per-channel affine + ReLU + valid-column crop (BatchNorm application)
# -----------------------------------------------------------------------------
def _affine_relu_crop_kernel(y_ref, s_ref, t_ref, o_ref, *, wo):
    y = y_ref[0, :, :wo, :]
    o_ref[0] = jnp.maximum(y * s_ref[...] + t_ref[...], 0.0)


def affine_relu_crop(band, scale, shift, wo):
    n, hh, ww, c = band.shape
    return pl.pallas_call(
        functools.partial(_affine_relu_crop_kernel, wo=wo),
        out_shape=jax.ShapeDtypeStruct((n, hh, wo, c), jnp.float32),
        grid=(n,),
        in_specs=[
            pl.BlockSpec((1, hh, ww, c), lambda i: (i, 0, 0, 0)),
            pl.BlockSpec((1, c), lambda i: (0, 0)),
            pl.BlockSpec((1, c), lambda i: (0, 0)),
        ],
        out_specs=pl.BlockSpec((1, hh, wo, c), lambda i: (i, 0, 0, 0)),
        compiler_params=pltpu.CompilerParams(
            dimension_semantics=("parallel",),
            vmem_limit_bytes=32 * 1024 * 1024),
    )(band, scale.reshape(1, c).astype(jnp.float32),
      shift.reshape(1, c).astype(jnp.float32))


# -----------------------------------------------------------------------------
# Kernel: full bidirectional LSTM layer + fused input projection + output Linear
#   Single pallas_call (no grid).  bf16 MXU operands, f32 accumulation.
# -----------------------------------------------------------------------------
def _bilstm_kernel(x_ref, w_in_ref, b_in_ref, w_hh_ref, w_lin_ref, b_lin_ref,
                   o_ref, xp_ref, hf_ref, hb_ref, *, hidden, t_len, batch):
    h4 = 4 * hidden

    # Input projection for ALL timesteps and both directions in one matmul.
    xin = x_ref[...].reshape(t_len * batch, x_ref.shape[-1])   # (T*B, F) bf16
    xp_ref[...] = (jnp.dot(xin, w_in_ref[...], preferred_element_type=jnp.float32)
                   + b_in_ref[...])                            # (T*B, 8H) f32

    w_hh = w_hh_ref[...]                                       # (2H, 8H) block-diag bf16

    h_f = jnp.zeros((batch, hidden), jnp.float32)
    c_f = jnp.zeros((batch, hidden), jnp.float32)
    h_b = jnp.zeros((batch, hidden), jnp.float32)
    c_b = jnp.zeros((batch, hidden), jnp.float32)

    # T is small and static: trace-time unrolled loop, all static indexing.
    for s in range(t_len):
        rs = t_len - 1 - s
        # Both directions' recurrent matmuls in ONE block-diagonal matmul.
        h_cat = jnp.concatenate([h_f, h_b], axis=1)            # (B, 2H)
        rec = jnp.dot(h_cat.astype(jnp.bfloat16), w_hh,
                      preferred_element_type=jnp.float32)      # (B, 8H)
        xg_f = xp_ref[s * batch:(s + 1) * batch, :]
        xg_b = xp_ref[rs * batch:(rs + 1) * batch, :]
        gates = jnp.concatenate([xg_f[:, :h4], xg_b[:, h4:]], axis=1) + rec
        sg = jax.nn.sigmoid(gates)
        th = jnp.tanh(gates)

        def cell(off, c_prev):
            # PyTorch gate order i, f, g, o; biases already folded into xp.
            i = sg[:, off + 0 * hidden: off + 1 * hidden]
            f = sg[:, off + 1 * hidden: off + 2 * hidden]
            g = th[:, off + 2 * hidden: off + 3 * hidden]
            o = sg[:, off + 3 * hidden: off + 4 * hidden]
            c_new = f * c_prev + i * g
            return o * jnp.tanh(c_new), c_new

        h_f, c_f = cell(0, c_f)
        h_b, c_b = cell(h4, c_b)
        hf_ref[s * batch:(s + 1) * batch, :] = h_f
        hb_ref[rs * batch:(rs + 1) * batch, :] = h_b

    # Final Linear over [h_fwd | h_bwd] for all timesteps: ONE matmul, ONE store.
    h_all = jnp.concatenate([hf_ref[...], hb_ref[...]], axis=1)        # (T*B, 2H)
    out = (jnp.dot(h_all.astype(jnp.bfloat16), w_lin_ref[...],
                   preferred_element_type=jnp.float32) + b_lin_ref[...])
    o_ref[...] = out.reshape(t_len, batch, -1)


def bilstm_layer(x_tbf, p, hidden):
    t_len, b, f = x_tbf.shape
    n_out = p["lin_w"].shape[0]
    h4 = 4 * hidden

    # One merged input projection for both directions: (F, 8H), biases folded.
    w_in = jnp.concatenate([p["w_ih_f"].T, p["w_ih_b"].T], axis=1)
    b_in = jnp.concatenate([p["b_ih_f"] + p["b_hh_f"],
                            p["b_ih_b"] + p["b_hh_b"]]).reshape(1, -1)
    # Block-diagonal recurrent weight: [h_f | h_b] @ blkdiag(Whh_f^T, Whh_b^T).
    w_hh = jnp.zeros((2 * hidden, 8 * hidden), jnp.float32)
    w_hh = w_hh.at[:hidden, :h4].set(p["w_hh_f"].T)
    w_hh = w_hh.at[hidden:, h4:].set(p["w_hh_b"].T)
    w_lin = p["lin_w"].T                                       # (2H, n_out)
    b_lin = p["lin_b"].reshape(1, -1)

    kernel = functools.partial(_bilstm_kernel, hidden=hidden, t_len=t_len, batch=b)
    vmem = pl.BlockSpec(memory_space=pltpu.MemorySpace.VMEM)
    return pl.pallas_call(
        kernel,
        out_shape=jax.ShapeDtypeStruct((t_len, b, n_out), jnp.float32),
        in_specs=[vmem] * 6,
        out_specs=vmem,
        scratch_shapes=[pltpu.VMEM((t_len * b, 8 * hidden), jnp.float32),
                        pltpu.VMEM((t_len * b, hidden), jnp.float32),
                        pltpu.VMEM((t_len * b, hidden), jnp.float32)],
        compiler_params=pltpu.CompilerParams(vmem_limit_bytes=16 * 1024 * 1024),
    )(x_tbf.astype(jnp.bfloat16), w_in.astype(jnp.bfloat16),
      b_in.astype(jnp.float32), w_hh.astype(jnp.bfloat16),
      w_lin.astype(jnp.bfloat16), b_lin.astype(jnp.float32))


# -----------------------------------------------------------------------------
# Model composition
# -----------------------------------------------------------------------------
def crnn_forward(x_nchw, params, n_hidden):
    x = jnp.transpose(x_nchw, (0, 2, 3, 1)).astype(jnp.float32)   # NCHW -> NHWC

    # pool after conv-block i: 's2' = 2x2/s2, 's1' = 2x2/s(2,1)/p(0,1)
    pool_modes = {0: "s2", 1: "s2", 3: "s1", 5: "s1"}
    for i, p in enumerate(params["conv"]):
        x = conv_block(x, p, pool_modes.get(i))

    n, h, w, c = x.shape
    assert h == 1, "the output height must be 1."
    seq = jnp.transpose(x[:, 0, :, :], (1, 0, 2))               # (T=W, N, 512)

    seq = bilstm_layer(seq, params["lstm"][0], n_hidden)
    seq = bilstm_layer(seq, params["lstm"][1], n_hidden)
    return seq


# -----------------------------------------------------------------------------
# Deterministic parameter initialization (synthetic; matches PyTorch shapes)
# -----------------------------------------------------------------------------
def init_params(key, n_channel, n_class, n_hidden):
    keys = iter(jax.random.split(key, 128))

    def nk():
        return next(keys)

    conv_cfg = [  # (cin, cout, k, pad, bn)
        (n_channel, 64, 3, 1, False),
        (64, 128, 3, 1, False),
        (128, 256, 3, 1, True),
        (256, 256, 3, 1, False),
        (256, 512, 3, 1, True),
        (512, 512, 3, 1, False),
        (512, 512, 2, 0, True),
    ]
    conv_params = []
    for cin, cout, k, pad, bn in conv_cfg:
        p = dict(
            dw_w=(jax.random.normal(nk(), (k, k, cin)) / (k * k)).astype(jnp.float32),
            dw_b=(0.01 * jax.random.normal(nk(), (1, cin))).astype(jnp.float32),
            pw_w=(jax.random.normal(nk(), (cin, cout)) / jnp.sqrt(cin)).astype(jnp.float32),
            pw_b=(0.01 * jax.random.normal(nk(), (1, cout))).astype(jnp.float32),
            k=k, pad=pad, bn=bn, gamma=None, beta=None)
        if bn:
            p["gamma"] = (1.0 + 0.1 * jax.random.normal(nk(), (cout,))).astype(jnp.float32)
            p["beta"] = (0.1 * jax.random.normal(nk(), (cout,))).astype(jnp.float32)
        conv_params.append(p)

    def init_bilstm(n_in, n_hid, n_out):
        s = 1.0 / jnp.sqrt(n_hid)

        def u(shape):
            return (s * jax.random.normal(nk(), shape)).astype(jnp.float32)

        return dict(
            w_ih_f=u((4 * n_hid, n_in)), w_hh_f=u((4 * n_hid, n_hid)),
            b_ih_f=u((4 * n_hid,)), b_hh_f=u((4 * n_hid,)),
            w_ih_b=u((4 * n_hid, n_in)), w_hh_b=u((4 * n_hid, n_hid)),
            b_ih_b=u((4 * n_hid,)), b_hh_b=u((4 * n_hid,)),
            lin_w=u((n_out, 2 * n_hid)), lin_b=u((n_out,)))

    lstm_params = [init_bilstm(512, n_hidden, n_hidden),
                   init_bilstm(n_hidden, n_hidden, n_class)]

    return dict(conv=conv_params, lstm=lstm_params)


# -----------------------------------------------------------------------------
if __name__ == "__main__":
    img_height = 32       # must be a multiple of 32
    img_width = 32
    batch = 2
    n_channel = 1
    n_class = 8
    n_hidden = 32

    key = jax.random.PRNGKey(0)
    k_x, k_p = jax.random.split(key)
    x = jax.random.normal(k_x, (batch, n_channel, img_height, img_width),
                          dtype=jnp.float32)
    params = init_params(k_p, n_channel, n_class, n_hidden)

    out = crnn_forward(x, params, n_hidden)
    out = jax.block_until_ready(out)

    # Expected: (T, batch, n_class) with T = img_width/4 + 1 = 9
    assert out.shape == (img_width // 4 + 1, batch, n_class), out.shape
    assert bool(jnp.all(jnp.isfinite(out)))
    print("KERNEL_OK")
</pallas_src>

<mosaic_0001>
module attributes {stable_mosaic.version = 11 : i64} {
  func.func @_conv_block_kernel(%arg0: i32, %arg1: memref<1x1280x9xf32, #tpu.memory_space<vmem>>, %arg2: memref<9x64xf32, #tpu.memory_space<vmem>>, %arg3: memref<1x64xf32, #tpu.memory_space<vmem>>, %arg4: memref<1x16x40x64xf32, #tpu.memory_space<vmem>>) attributes {dimension_semantics = [#tpu.dimension_semantics<parallel>], iteration_bounds = array<i64: 2>, scalar_prefetch = 0 : i64, scratch_operands = 0 : i64, tpu.core_type = #tpu.core_type<tc>, window_params = [{transform_indices = @transform_0, window_bounds = array<i64: 1, 1280, 9>}, {pipeline_mode = #tpu.pipeline_mode<synchronous>, transform_indices = @transform_1, window_bounds = array<i64: 9, 64>}, {pipeline_mode = #tpu.pipeline_mode<synchronous>, transform_indices = @transform_2, window_bounds = array<i64: 1, 64>}, {transform_indices = @transform_3, window_bounds = array<i64: 1, 16, 40, 64>}]} {
    %c0 = arith.constant 0 : index
    %c0_0 = arith.constant 0 : index
    %c0_1 = arith.constant 0 : index
    %0 = vector.load %arg1[%c0, %c0_0, %c0_1] : memref<1x1280x9xf32, #tpu.memory_space<vmem>>, vector<1x1280x9xf32>
    %1 = vector.shape_cast %0 : vector<1x1280x9xf32> to vector<1280x9xf32>
    %c0_2 = arith.constant 0 : index
    %c0_3 = arith.constant 0 : index
    %2 = vector.load %arg2[%c0_2, %c0_3] : memref<9x64xf32, #tpu.memory_space<vmem>>, vector<9x64xf32>
    %cst = arith.constant dense<0.000000e+00> : vector<1280x64xf32>
    %3 = tpu.matmul %1, %2, %cst {dimension_numbers = #tpu.dot_dimension_numbers<[1], [0], [0], [1], [0, 0, 1, 1], [], []>} : vector<1280x9xf32>, vector<9x64xf32>, vector<1280x64xf32> -> vector<1280x64xf32>
    %c0_4 = arith.constant 0 : index
    %c0_5 = arith.constant 0 : index
    %4 = vector.load %arg3[%c0_4, %c0_5] : memref<1x64xf32, #tpu.memory_space<vmem>>, vector<1x64xf32>
    %5 = vector.broadcast %4 : vector<1x64xf32> to vector<1280x64xf32>
    %6 = arith.addf %3, %5 : vector<1280x64xf32>
    %cst_6 = arith.constant 0.000000e+00 : f32
    %7 = vector.broadcast %cst_6 : f32 to vector<1280x64xf32>
    %8 = arith.maximumf %6, %7 : vector<1280x64xf32>
    %9 = vector.shape_cast %8 : vector<1280x64xf32> to vector<16x80x64xf32>
    %10 = vector.extract_strided_slice %9 {offsets = [0, 0, 0], sizes = [16, 40, 64], strides = [1, 1, 1]} : vector<16x80x64xf32> to vector<16x40x64xf32>
    %11 = vector.extract_strided_slice %9 {offsets = [0, 40, 0], sizes = [16, 40, 64], strides = [1, 1, 1]} : vector<16x80x64xf32> to vector<16x40x64xf32>
    %12 = arith.maximumf %10, %11 : vector<16x40x64xf32>
    %13 = vector.shape_cast %12 : vector<16x40x64xf32> to vector<640x64xf32>
    %14 = vector.extract_strided_slice %13 {offsets = [1, 0], sizes = [639, 64], strides = [1, 1]} : vector<640x64xf32> to vector<639x64xf32>
    %cst_7 = arith.constant 0.000000e+00 : f32
    %15 = vector.broadcast %cst_7 : f32 to vector<1x64xf32>
    %16 = tpu.concatenate %14, %15 in 0 : vector<639x64xf32>, vector<1x64xf32> -> vector<640x64xf32>
    %17 = arith.maximumf %13, %16 : vector<640x64xf32>
    %18 = vector.shape_cast %17 : vector<640x64xf32> to vector<16x40x64xf32>
    %c0_8 = arith.constant 0 : index
    %c0_9 = arith.constant 0 : index
    %c0_10 = arith.constant 0 : index
    %c0_11 = arith.constant 0 : index
    %19 = vector.load %arg4[%c0_8, %c0_9, %c0_10, %c0_11] : memref<1x16x40x64xf32, #tpu.memory_space<vmem>>, vector<1x16x40x64xf32>
    %20 = vector.shape_cast %19 : vector<1x16x40x64xf32> to vector<16x40x64xf32>
    %21 = vector.shape_cast %18 : vector<16x40x64xf32> to vector<1x16x40x64xf32>
    tpu.vector_store %arg4[%c0_8, %c0_9, %c0_10, %c0_11], %21 {strides = array<i32>} : memref<1x16x40x64xf32, #tpu.memory_space<vmem>>, vector<1x16x40x64xf32>,
    return
  }
  func.func @transform_0(%arg0: i32) -> (i32, i32, i32) {
    %c0_i32 = arith.constant 0 : i32
    %c0_i32_0 = arith.constant 0 : i32
    %c0_i32_1 = arith.constant 0 : i32
    return %arg0, %c0_i32, %c0_i32_0 : i32, i32, i32
  }
  func.func @transform_1(%arg0: i32) -> (i32, i32) {
    %c0_i32 = arith.constant 0 : i32
    %c0_i32_0 = arith.constant 0 : i32
    %c0_i32_1 = arith.constant 0 : i32
    return %c0_i32, %c0_i32_0 : i32, i32
  }
  func.func @transform_2(%arg0: i32) -> (i32, i32) {
    %c0_i32 = arith.constant 0 : i32
    %c0_i32_0 = arith.constant 0 : i32
    %c0_i32_1 = arith.constant 0 : i32
    return %c0_i32, %c0_i32_0 : i32, i32
  }
  func.func @transform_3(%arg0: i32) -> (i32, i32, i32, i32) {
    %c0_i32 = arith.constant 0 : i32
    %c0_i32_0 = arith.constant 0 : i32
    %c0_i32_1 = arith.constant 0 : i32
    %c0_i32_2 = arith.constant 0 : i32
    return %arg0, %c0_i32, %c0_i32_0, %c0_i32_1 : i32, i32, i32, i32
  }
}

</mosaic_0001>

<bundles_post_ra>
// kernel: tpu_custom_call.1
= control target key start
LH: loop header
LB: loop body
LE: loop exit
PB: predicated region body
PF: predicated region fallthrough
CT: control target
= control target key end

     0   :  { %8 = vsyncpa [#allocation3], 0  ;;  %s4329_s0 = inlined_call_operand.vmem [shape: f32[2,1280,9], index: 0, kind: input, shape index: {}]   ;;  %s4330_s1 = inlined_call_operand.vmem [shape: f32[9,64], index: 1, kind: input, shape index: {}]   ;;  %s4331_s2 = inlined_call_operand.vmem [shape: f32[1,64], index: 2, kind: input, shape index: {}]   ;;  %s4332_s3 = inlined_call_operand.hbm [shape: f32[2,16,40,64], index: 3, kind: output, shape index: {}]  }
   0x1   :  { %10 = vsyncpa [#allocation3 + $0x1], 0  ;;  %s3204_s12 = smov 0   ;;  %s3206_s13 = smov 0  }
   0x2   :  { %s3208_s14 = smov 0   ;;  %s3210_s15 = smov 0  }
   0x3 LB: > { %s3225_s16 = sadd.s32 4294967295, %s3178_s15   ;;  %s2486_s17 = sadd.s32 4294967294, %s3178_s15   ;;  %s3178_s15 = sphi %s3210_s15, %s4338_s15   ;;  %s3174_s14 = sphi %s3208_s14, %s4337_s14   ;;  %s3170_s13 = sphi %s3206_s13, %s4336_s13   ;;  %s3166_s12 = sphi %s3204_s12, %s4335_s12  }
   0x4   : > { %s3229_s18 = sadd.s32 1, %s3178_s15   ;;  %s91_s19 = sadd.s32 1, %s3174_s14 }
   0x5   : > { %s88_s20 = ssub.s32 %s3178_s15, %s3229_s18  ;;  %p101_p0 = scmp.ne.s32.totalorder %s3174_s14, %s3170_s13 }
   0x6   : > { %p89_p1 = scmp.eq.s32.totalorder %s88_s20, 0  ;;  %p102_p2 = scmp.eq.s32.totalorder %s3225_s16, 1 }
   0x7   : > { %p107_p3 = scmp.ne.s32.totalorder %s3170_s13, %s3166_s12  ;;  %p108_p4 = scmp.eq.s32.totalorder %s2486_s17, 1 }
   0x8   : > { %s3240_s21 = scalar_select %p89_p1, %s3174_s14, %s91_s19  }
   0x9   : > { %p3242_p5 = por %p102_p2, %p101_p0  ;;  %p3246_p6 = por %p108_p4, %p107_p3 }
   0xa   : > { %p2489_p7 = scmp.ge.s32.totalorder %s3178_s15, 1  ;;  %p140_p8 = scmp.lt.s32.totalorder %s3178_s15, 3 }
   0xc   : > { %p141_p9 = pnand %p2489_p7, %p140_p8 }
   0xd   : > { %v329_v0 = vld [vmem:[%s4330_s1] sm:$0xff] (!%p141_p9)  ;;  %v330_v1 = vld [vmem:[%s4330_s1 + $0x8] sm:$0x1] (!%p141_p9)  ;;  %vm819_vm0 = vcmask (!%p141_p9), 1040384   ;;  %p164_p10 = scmp.lt.s32.totalorder (!%p141_p9), %s3225_s16, 1  ;;  %vm3180_vm1 = vmmov (!%p141_p9), 1  }
   0xe   : > { %144 = sbr.rel (%p141_p9) target bundleno = 430 (0x1ae), region = 32  ;;  %v3062_v2 = vpack.c.bf16 (!%p141_p9), %v330_v1, %v329_v0  ;;  %vm3063_vm2 = vmpackc.low (!%p141_p9), %vm819_vm0, %vm3180_vm1  ;;  %vm338_vm3 = vcmask (!%p141_p9), 72704   ;;  %vm2008_vm4 = vcmask (!%p141_p9), 1046528   ;;  %vm2329_vm5 = vcmask (!%p141_p9), 523264   ;;  %s161_s8 = sand.u32 (!%p141_p9), 1, %s3170_s13  }
   0xf   : > { %s3625_s9 = smul.u32 (!%p141_p9), 640, %s161_s8  ;;  %s4288_s26 = scalar_lea.sflag (!%p141_p9), [#allocation3], %s161_s8 }
  0x10   : > { %3064 = vmatprep.subr.msk.bf16.mxu0 (!%p141_p9), %vm3063_vm2, %v3062_v2  ;;  %3068 = vmatprep.subr.msk.bf16.mxu1 (!%p141_p9), %vm3063_vm2, %v3062_v2  ;;  %s3072_s19 = smul.u32 (!%p141_p9), 10240, %s3225_s16 }
  0x11   : > { %3067 = vmatpush3.bf16.msk.msra.mxu0 (!%p141_p9), %vm3063_vm2, %v3062_v2  ;;  %3069 = vmatpush3.bf16.msk.msra.mxu1 (!%p141_p9), %vm3063_vm2, %v3062_v2  ;;  %s3648_s10 = scalar_lea.vmem (!%p141_p9), [#allocation2], %s3625_s9 }
  0x12   : > { %s2424_s20 = sshll.u32 (!%p141_p9), %s3648_s10, 4  ;;  %s4274_s25 = scalar_lea.hbm (!%p141_p9), %s4332_s3, %s3072_s19  ;;  %s4276_s20 = int_to_ptr.vmem [resolvable:$true] %s2424_s20 }
  0x13   : > { %s3116_s27 = scalar_lea.vmem (!%p141_p9), %s4276_s20, 10240 }
  0x14   : > { %p3117_p11 = scmp.ne.s32.totalorder (!%p141_p9), %s4276_s20, %s3116_s27 }
  0x15   : > { %s165_s28 = scalar_select %p164_p10, %s3225_s16, 1 }
  0x16   : > { %p3118_p12 = pnand %p3117_p11, %p3242_p5 }
  0x17   : > { %s3071_s29 = smul.u32 1280, %s165_s28  ;;  %s3181_s28 = smov [#allocation2]  }
  0x18   : > { %p3119_p13 = pneg %p3118_p12 }
  0x19   : > { %s3263_s5 = scalar_lea.vmem %s4329_s0, %s3071_s29  ;;  %s3120_s29 = sshll.u32 %s3181_s28, 4  ;;  %s3121_s29 = int_to_ptr.vmem [resolvable:$false] %s3120_s29 }
  0x1a   : > { %v169_v3 = vld [vmem:[%s3263_s5] sm:$0xff]  ;;  %v170_v5 = vld [vmem:[%s3263_s5 + $0x8] sm:$0xff]  ;;  %v171_v7 = vld [vmem:[%s3263_s5 + $0x10] sm:$0xff]  ;;  %s3122_s30 = scalar_lea.vmem %s3121_s29, 20480  ;;  %p3123_p0 = scmp.lt.s32.totalorder %s4276_s20, %s3121_s29 }
  0x1b   : > { %v249_v4 = vld [vmem:[%s3263_s5 + $0x280] sm:$0xff]  ;;  %2822 = vmatprep.mubr.msk.f32.mxu0 %vm338_vm3, %v169_v3  ;;  %v250_v6 = vld [vmem:[%s3263_s5 + $0x288] sm:$0xff]  ;;  %v251_v8 = vld [vmem:[%s3263_s5 + $0x290] sm:$0xff]  ;;  %p3124_p1 = scmp.lt.s32.totalorder %s3122_s30, %s3116_s27 }
  0x1c   : > { %2942 = vmatprep.mubr.msk.f32.mxu1 %vm338_vm3, %v249_v4  ;;  %2823 = vmatmul.mubr.msk.f32.vlgmr.msra.gmra.mrb[0].mxu0 %vm338_vm3, %v170_v5  ;;  %v172_v9 = vld [vmem:[%s3263_s5 + $0x18] sm:$0xff]  ;;  %v173_v11 = vld [vmem:[%s3263_s5 + $0x20] sm:$0xff]  ;;  %v174_v13 = vld [vmem:[%s3263_s5 + $0x28] sm:$0xff] }
  0x1d   : > { %2943 = vmatmul.mubr.msk.f32.vlgmr.msra.gmra.mrb[0].mxu1 %vm338_vm3, %v250_v6  ;;  %2825 = vmatprep.mubr.msk.f32.mxu0 %vm338_vm3, %v171_v7  ;;  %v252_v10 = vld [vmem:[%s3263_s5 + $0x298] sm:$0xff]  ;;  %v253_v12 = vld [vmem:[%s3263_s5 + $0x2a0] sm:$0xff]  ;;  %v254_v14 = vld [vmem:[%s3263_s5 + $0x2a8] sm:$0xff]  ;;  %p3125_p2 = por %p3124_p1, %p3123_p0 }
  0x1e   : > { %2945 = vmatprep.mubr.msk.f32.mxu1 %vm338_vm3, %v251_v8  ;;  %v175_v15 = vld [vmem:[%s3263_s5 + $0x30] sm:$0xff]  ;;  %v176_v17 = vld [vmem:[%s3263_s5 + $0x38] sm:$0xff]  ;;  %v177_v19 = vld [vmem:[%s3263_s5 + $0x40] sm:$0xff] }
  0x1f   : > { %v255_v16 = vld [vmem:[%s3263_s5 + $0x2b0] sm:$0xff]  ;;  %v256_v18 = vld [vmem:[%s3263_s5 + $0x2b8] sm:$0xff]  ;;  %v257_v20 = vld [vmem:[%s3263_s5 + $0x2c0] sm:$0xff]  ;;  %p3126_p3 = pnand %p3125_p2, %p3119_p13 }
  0x20   : > { %2826 = vmatmul.mubr.msk.f32.gmra.mrb[2].mxu0 %vm338_vm3, %v172_v9  ;;  %v178_v21 = vld [vmem:[%s3263_s5 + $0x48] sm:$0xff]  ;;  %v179_v23 = vld [vmem:[%s3263_s5 + $0x50] sm:$0xff]  ;;  %v180_v25 = vld [vmem:[%s3263_s5 + $0x58] sm:$0xff] }
  0x21   : > { %2946 = vmatmul.mubr.msk.f32.gmra.mrb[2].mxu1 %vm338_vm3, %v252_v10  ;;  %2828 = vmatprep.mubr.msk.f32.mxu0 %vm338_vm3, %v173_v11  ;;  %v258_v22 = vld [vmem:[%s3263_s5 + $0x2c8] sm:$0xff]  ;;  %v259_v24 = vld [vmem:[%s3263_s5 + $0x2d0] sm:$0xff]  ;;  %v260_v26 = vld [vmem:[%s3263_s5 + $0x2d8] sm:$0xff] }
  0x22   : > { %2948 = vmatprep.mubr.msk.f32.mxu1 %vm338_vm3, %v253_v12  ;;  %v181_v27 = vld [vmem:[%s3263_s5 + $0x60] sm:$0xff]  ;;  %v182_v29 = vld [vmem:[%s3263_s5 + $0x68] sm:$0xff]  ;;  %v183_v31 = vld [vmem:[%s3263_s5 + $0x70] sm:$0xff] }
  0x23   : > { %v261_v28 = vld [vmem:[%s3263_s5 + $0x2e0] sm:$0xff]  ;;  %v262_v30 = vld [vmem:[%s3263_s5 + $0x2e8] sm:$0xff]  ;;  %v263_v32 = vld [vmem:[%s3263_s5 + $0x2f0] sm:$0xff] }
  0x24   : > { %2829 = vmatmul.mubr.msk.f32.gmra.mrb[4].mxu0 %vm338_vm3, %v174_v13  ;;  %v184_v33 = vld [vmem:[%s3263_s5 + $0x78] sm:$0xff]  ;;  %v185_v35 = vld [vmem:[%s3263_s5 + $0x80] sm:$0xff]  ;;  %v186_v37 = vld [vmem:[%s3263_s5 + $0x88] sm:$0xff] }
  0x25   : > { %2949 = vmatmul.mubr.msk.f32.gmra.mrb[4].mxu1 %vm338_vm3, %v254_v14  ;;  %2831 = vmatprep.mubr.msk.f32.mxu0 %vm338_vm3, %v175_v15  ;;  %v264_v34 = vld [vmem:[%s3263_s5 + $0x2f8] sm:$0xff]  ;;  %v265_v36 = vld [vmem:[%s3263_s5 + $0x300] sm:$0xff]  ;;  %v266_v38 = vld [vmem:[%s3263_s5 + $0x308] sm:$0xff] }
  0x26   : > { %2951 = vmatprep.mubr.msk.f32.mxu1 %vm338_vm3, %v255_v16  ;;  %v187_v39 = vld [vmem:[%s3263_s5 + $0x90] sm:$0xff]  ;;  %v188_v41 = vld [vmem:[%s3263_s5 + $0x98] sm:$0xff]  ;;  %v189_v43 = vld [vmem:[%s3263_s5 + $0xa0] sm:$0xff] }
  0x27   : > { %v267_v40 = vld [vmem:[%s3263_s5 + $0x310] sm:$0xff]  ;;  %v268_v42 = vld [vmem:[%s3263_s5 + $0x318] sm:$0xff]  ;;  %v269_v44 = vld [vmem:[%s3263_s5 + $0x320] sm:$0xff] }
  0x28   : > { %2832 = vmatmul.mubr.msk.f32.gmra.mrb[6].mxu0 %vm338_vm3, %v176_v17  ;;  %v190_v45 = vld [vmem:[%s3263_s5 + $0xa8] sm:$0xff]  ;;  %v191_v47 = vld [vmem:[%s3263_s5 + $0xb0] sm:$0xff]  ;;  %v192_v49 = vld [vmem:[%s3263_s5 + $0xb8] sm:$0xff] }
  0x29   : > { %2952 = vmatmul.mubr.msk.f32.gmra.mrb[6].mxu1 %vm338_vm3, %v256_v18  ;;  %2834 = vmatprep.mubr.msk.f32.mxu0 %vm338_vm3, %v177_v19  ;;  %v270_v46 = vld [vmem:[%s3263_s5 + $0x328] sm:$0xff]  ;;  %v271_v48 = vld [vmem:[%s3263_s5 + $0x330] sm:$0xff]  ;;  %v272_v50 = vld [vmem:[%s3263_s5 + $0x338] sm:$0xff] }
  0x2a   : > { %2954 = vmatprep.mubr.msk.f32.mxu1 %vm338_vm3, %v257_v20  ;;  %v193_v51 = vld [vmem:[%s3263_s5 + $0xc0] sm:$0xff]  ;;  %v194_v53 = vld [vmem:[%s3263_s5 + $0xc8] sm:$0xff]  ;;  %v195_v55 = vld [vmem:[%s3263_s5 + $0xd0] sm:$0xff] }
  0x2b   : > { %v273_v52 = vld [vmem:[%s3263_s5 + $0x340] sm:$0xff]  ;;  %v274_v54 = vld [vmem:[%s3263_s5 + $0x348] sm:$0xff]  ;;  %v275_v56 = vld [vmem:[%s3263_s5 + $0x350] sm:$0xff] }
  0x2c   : > { %2835 = vmatmul.mubr.msk.f32.gmra.mrb[8].mxu0 %vm338_vm3, %v178_v21  ;;  %v196_v57 = vld [vmem:[%s3263_s5 + $0xd8] sm:$0xff]  ;;  %v197_v59 = vld [vmem:[%s3263_s5 + $0xe0] sm:$0xff]  ;;  %v198_v61 = vld [vmem:[%s3263_s5 + $0xe8] sm:$0xff] }
  0x2d   : > { %2955 = vmatmul.mubr.msk.f32.gmra.mrb[8].mxu1 %vm338_vm3, %v258_v22  ;;  %2837 = vmatprep.mubr.msk.f32.mxu0 %vm338_vm3, %v179_v23  ;;  %v276_v58 = vld [vmem:[%s3263_s5 + $0x358] sm:$0xff]  ;;  %v277_v60 = vld [vmem:[%s3263_s5 + $0x360] sm:$0xff]  ;;  %v278_v62 = vld [vmem:[%s3263_s5 + $0x368] sm:$0xff] }
  0x2e   : > { %2957 = vmatprep.mubr.msk.f32.mxu1 %vm338_vm3, %v259_v24  ;;  %v199_v63 = vld [vmem:[%s3263_s5 + $0xf0] sm:$0xff]  ;;  %v200_v1 = vld [vmem:[%s3263_s5 + $0xf8] sm:$0xff]  ;;  %v201_v3 = vld [vmem:[%s3263_s5 + $0x100] sm:$0xff] }
  0x2f   : > { %v279_v0 = vld [vmem:[%s3263_s5 + $0x370] sm:$0xff]  ;;  %v280_v2 = vld [vmem:[%s3263_s5 + $0x378] sm:$0xff]  ;;  %v281_v4 = vld [vmem:[%s3263_s5 + $0x380] sm:$0xff] }
  0x30   : > { %2838 = vmatmul.mubr.msk.f32.gmra.mrb[10].mxu0 %vm338_vm3, %v180_v25  ;;  %v202_v5 = vld [vmem:[%s3263_s5 + $0x108] sm:$0xff]  ;;  %v203_v7 = vld [vmem:[%s3263_s5 + $0x110] sm:$0xff]  ;;  %v204_v9 = vld [vmem:[%s3263_s5 + $0x118] sm:$0xff] }
  0x31   : > { %2958 = vmatmul.mubr.msk.f32.gmra.mrb[10].mxu1 %vm338_vm3, %v260_v26  ;;  %2840 = vmatprep.mubr.msk.f32.mxu0 %vm338_vm3, %v181_v27  ;;  %v282_v6 = vld [vmem:[%s3263_s5 + $0x388] sm:$0xff]  ;;  %v283_v8 = vld [vmem:[%s3263_s5 + $0x390] sm:$0xff]  ;;  %v284_v10 = vld [vmem:[%s3263_s5 + $0x398] sm:$0xff] }
  0x32   : > { %2960 = vmatprep.mubr.msk.f32.mxu1 %vm338_vm3, %v261_v28  ;;  %v205_v11 = vld [vmem:[%s3263_s5 + $0x120] sm:$0xff]  ;;  %v206_v13 = vld [vmem:[%s3263_s5 + $0x128] sm:$0xff]  ;;  %v207_v15 = vld [vmem:[%s3263_s5 + $0x130] sm:$0xff] }
  0x33   : > { %v285_v12 = vld [vmem:[%s3263_s5 + $0x3a0] sm:$0xff]  ;;  %v286_v14 = vld [vmem:[%s3263_s5 + $0x3a8] sm:$0xff]  ;;  %v287_v16 = vld [vmem:[%s3263_s5 + $0x3b0] sm:$0xff] }
  0x34   : > { %2841 = vmatmul.mubr.msk.f32.gmra.mrb[12].mxu0 %vm338_vm3, %v182_v29  ;;  %v208_v17 = vld [vmem:[%s3263_s5 + $0x138] sm:$0xff]  ;;  %v209_v19 = vld [vmem:[%s3263_s5 + $0x140] sm:$0xff]  ;;  %v210_v21 = vld [vmem:[%s3263_s5 + $0x148] sm:$0xff] }
  0x35   : > { %2961 = vmatmul.mubr.msk.f32.gmra.mrb[12].mxu1 %vm338_vm3, %v262_v30  ;;  %2843 = vmatprep.mubr.msk.f32.mxu0 %vm338_vm3, %v183_v31  ;;  %v288_v18 = vld [vmem:[%s3263_s5 + $0x3b8] sm:$0xff]  ;;  %v289_v20 = vld [vmem:[%s3263_s5 + $0x3c0] sm:$0xff]  ;;  %v290_v22 = vld [vmem:[%s3263_s5 + $0x3c8] sm:$0xff] }
  0x36   : > { %2963 = vmatprep.mubr.msk.f32.mxu1 %vm338_vm3, %v263_v32  ;;  %v211_v23 = vld [vmem:[%s3263_s5 + $0x150] sm:$0xff]  ;;  %v212_v25 = vld [vmem:[%s3263_s5 + $0x158] sm:$0xff]  ;;  %v213_v27 = vld [vmem:[%s3263_s5 + $0x160] sm:$0xff] }
  0x37   : > { %v291_v24 = vld [vmem:[%s3263_s5 + $0x3d0] sm:$0xff]  ;;  %v292_v26 = vld [vmem:[%s3263_s5 + $0x3d8] sm:$0xff]  ;;  %v293_v28 = vld [vmem:[%s3263_s5 + $0x3e0] sm:$0xff] }
  0x38   : > { %2844 = vmatmul.mubr.msk.f32.gmra.mrb[14].mxu0 %vm338_vm3, %v184_v33  ;;  %v214_v29 = vld [vmem:[%s3263_s5 + $0x168] sm:$0xff]  ;;  %v215_v31 = vld [vmem:[%s3263_s5 + $0x170] sm:$0xff]  ;;  %v216_v33 = vld [vmem:[%s3263_s5 + $0x178] sm:$0xff] }
  0x39   : > { %2964 = vmatmul.mubr.msk.f32.gmra.mrb[14].mxu1 %vm338_vm3, %v264_v34  ;;  %2846 = vmatprep.mubr.msk.f32.mxu0 %vm338_vm3, %v185_v35  ;;  %v294_v30 = vld [vmem:[%s3263_s5 + $0x3e8] sm:$0xff]  ;;  %v295_v32 = vld [vmem:[%s3263_s5 + $0x3f0] sm:$0xff]  ;;  %v296_v34 = vld [vmem:[%s3263_s5 + $0x3f8] sm:$0xff] }
  0x3a   : > { %2966 = vmatprep.mubr.msk.f32.mxu1 %vm338_vm3, %v265_v36  ;;  %v217_v35 = vld [vmem:[%s3263_s5 + $0x180] sm:$0xff] }
  0x3b   : > { %v297_v36 = vld [vmem:[%s3263_s5 + $0x400] sm:$0xff] }
  0x3c   : > { %2847 = vmatmul.mubr.msk.f32.gmra.mrb[16].mxu0 %vm338_vm3, %v186_v37  ;;  %v218_v37 = vld [vmem:[%s3263_s5 + $0x188] sm:$0xff] }
  0x3d   : > { %2967 = vmatmul.mubr.msk.f32.gmra.mrb[16].mxu1 %vm338_vm3, %v266_v38  ;;  %2849 = vmatprep.mubr.msk.f32.mxu0 %vm338_vm3, %v187_v39  ;;  %v298_v38 = vld [vmem:[%s3263_s5 + $0x408] sm:$0xff]  ;;  %v219_v39 = vld [vmem:[%s3263_s5 + $0x190] sm:$0xff] }
  0x3e   : > { %2969 = vmatprep.mubr.msk.f32.mxu1 %vm338_vm3, %v267_v40  ;;  %v299_v40 = vld [vmem:[%s3263_s5 + $0x410] sm:$0xff] }
  0x40   : > { %2850 = vmatmul.mubr.msk.f32.gmra.mrb[18].mxu0 %vm338_vm3, %v188_v41  ;;  %v220_v41 = vld [vmem:[%s3263_s5 + $0x198] sm:$0xff] }
  0x41   : > { %2970 = vmatmul.mubr.msk.f32.gmra.mrb[18].mxu1 %vm338_vm3, %v268_v42  ;;  %2852 = vmatprep.mubr.msk.f32.mxu0 %vm338_vm3, %v189_v43  ;;  %v300_v42 = vld [vmem:[%s3263_s5 + $0x418] sm:$0xff]  ;;  %v221_v43 = vld [vmem:[%s3263_s5 + $0x1a0] sm:$0xff] }
  0x42   : > { %2972 = vmatprep.mubr.msk.f32.mxu1 %vm338_vm3, %v269_v44  ;;  %v301_v44 = vld [vmem:[%s3263_s5 + $0x420] sm:$0xff] }
  0x44   : > { %2853 = vmatmul.mubr.msk.f32.gmra.mrb[20].mxu0 %vm338_vm3, %v190_v45  ;;  %v222_v45 = vld [vmem:[%s3263_s5 + $0x1a8] sm:$0xff] }
  0x45   : > { %2973 = vmatmul.mubr.msk.f32.gmra.mrb[20].mxu1 %vm338_vm3, %v270_v46  ;;  %2855 = vmatprep.mubr.msk.f32.mxu0 %vm338_vm3, %v191_v47  ;;  %v302_v46 = vld [vmem:[%s3263_s5 + $0x428] sm:$0xff]  ;;  %v223_v47 = vld [vmem:[%s3263_s5 + $0x1b0] sm:$0xff] }
  0x46   : > { %2975 = vmatprep.mubr.msk.f32.mxu1 %vm338_vm3, %v271_v48  ;;  %v303_v48 = vld [vmem:[%s3263_s5 + $0x430] sm:$0xff] }
  0x48   : > { %2856 = vmatmul.mubr.msk.f32.gmra.mrb[22].mxu0 %vm338_vm3, %v192_v49  ;;  %v224_v49 = vld [vmem:[%s3263_s5 + $0x1b8] sm:$0xff] }
  0x49   : > { %2976 = vmatmul.mubr.msk.f32.gmra.mrb[22].mxu1 %vm338_vm3, %v272_v50  ;;  %2858 = vmatprep.mubr.msk.f32.mxu0 %vm338_vm3, %v193_v51  ;;  %v304_v50 = vld [vmem:[%s3263_s5 + $0x438] sm:$0xff]  ;;  %v225_v51 = vld [vmem:[%s3263_s5 + $0x1c0] sm:$0xff] }
  0x4a   : > { %2978 = vmatprep.mubr.msk.f32.mxu1 %vm338_vm3, %v273_v52  ;;  %v305_v52 = vld [vmem:[%s3263_s5 + $0x440] sm:$0xff] }
  0x4c   : > { %2859 = vmatmul.mubr.msk.f32.gmra.mrb[24].mxu0 %vm338_vm3, %v194_v53  ;;  %v226_v53 = vld [vmem:[%s3263_s5 + $0x1c8] sm:$0xff] }
  0x4d   : > { %2979 = vmatmul.mubr.msk.f32.gmra.mrb[24].mxu1 %vm338_vm3, %v274_v54  ;;  %2861 = vmatprep.mubr.msk.f32.mxu0 %vm338_vm3, %v195_v55  ;;  %v306_v54 = vld [vmem:[%s3263_s5 + $0x448] sm:$0xff]  ;;  %v227_v55 = vld [vmem:[%s3263_s5 + $0x1d0] sm:$0xff] }
  0x4e   : > { %2981 = vmatprep.mubr.msk.f32.mxu1 %vm338_vm3, %v275_v56  ;;  %v307_v56 = vld [vmem:[%s3263_s5 + $0x450] sm:$0xff] }
  0x50   : > { %2862 = vmatmul.mubr.msk.f32.gmra.mrb[26].mxu0 %vm338_vm3, %v196_v57  ;;  %v228_v57 = vld [vmem:[%s3263_s5 + $0x1d8] sm:$0xff] }
  0x51   : > { %2982 = vmatmul.mubr.msk.f32.gmra.mrb[26].mxu1 %vm338_vm3, %v276_v58  ;;  %2864 = vmatprep.mubr.msk.f32.mxu0 %vm338_vm3, %v197_v59  ;;  %v308_v58 = vld [vmem:[%s3263_s5 + $0x458] sm:$0xff]  ;;  %v229_v59 = vld [vmem:[%s3263_s5 + $0x1e0] sm:$0xff] }
  0x52   : > { %2984 = vmatprep.mubr.msk.f32.mxu1 %vm338_vm3, %v277_v60  ;;  %v309_v60 = vld [vmem:[%s3263_s5 + $0x460] sm:$0xff] }
  0x54   : > { %2865 = vmatmul.mubr.msk.f32.gmra.mrb[28].mxu0 %vm338_vm3, %v198_v61  ;;  %v230_v61 = vld [vmem:[%s3263_s5 + $0x1e8] sm:$0xff] }
  0x55   : > { %2985 = vmatmul.mubr.msk.f32.gmra.mrb[28].mxu1 %vm338_vm3, %v278_v62  ;;  %2867 = vmatprep.mubr.msk.f32.mxu0 %vm338_vm3, %v199_v63  ;;  %v310_v62 = vld [vmem:[%s3263_s5 + $0x468] sm:$0xff]  ;;  %v231_v63 = vld [vmem:[%s3263_s5 + $0x1f0] sm:$0xff] }
  0x56   : > { %2987 = vmatprep.mubr.msk.f32.mxu1 %vm338_vm3, %v279_v0  ;;  %v311_v0 = vld [vmem:[%s3263_s5 + $0x470] sm:$0xff] }
  0x58   : > { %2868 = vmatmul.mubr.msk.f32.gmra.mrb[30].mxu0 %vm338_vm3, %v200_v1  ;;  %v232_v1 = vld [vmem:[%s3263_s5 + $0x1f8] sm:$0xff] }
  0x59   : > { %2988 = vmatmul.mubr.msk.f32.gmra.mrb[30].mxu1 %vm338_vm3, %v280_v2  ;;  %2870 = vmatprep.mubr.msk.f32.mxu0 %vm338_vm3, %v201_v3  ;;  %v312_v2 = vld [vmem:[%s3263_s5 + $0x478] sm:$0xff]  ;;  %v233_v3 = vld [vmem:[%s3263_s5 + $0x200] sm:$0xff] }
  0x5a   : > { %2990 = vmatprep.mubr.msk.f32.mxu1 %vm338_vm3, %v281_v4  ;;  %v313_v4 = vld [vmem:[%s3263_s5 + $0x480] sm:$0xff] }
  0x5c   : > { %2871 = vmatmul.mubr.msk.f32.gmra.mrb[32].mxu0 %vm338_vm3, %v202_v5  ;;  %v234_v5 = vld [vmem:[%s3263_s5 + $0x208] sm:$0xff] }
  0x5d   : > { %2991 = vmatmul.mubr.msk.f32.gmra.mrb[32].mxu1 %vm338_vm3, %v282_v6  ;;  %2873 = vmatprep.mubr.msk.f32.mxu0 %vm338_vm3, %v203_v7  ;;  %v314_v6 = vld [vmem:[%s3263_s5 + $0x488] sm:$0xff]  ;;  %v235_v7 = vld [vmem:[%s3263_s5 + $0x210] sm:$0xff] }
  0x5e   : > { %2993 = vmatprep.mubr.msk.f32.mxu1 %vm338_vm3, %v283_v8  ;;  %v315_v8 = vld [vmem:[%s3263_s5 + $0x490] sm:$0xff] }
  0x60   : > { %2874 = vmatmul.mubr.msk.f32.gmra.mrb[34].mxu0 %vm338_vm3, %v204_v9  ;;  %v236_v9 = vld [vmem:[%s3263_s5 + $0x218] sm:$0xff] }
  0x61   : > { %2994 = vmatmul.mubr.msk.f32.gmra.mrb[34].mxu1 %vm338_vm3, %v284_v10  ;;  %2876 = vmatprep.mubr.msk.f32.mxu0 %vm338_vm3, %v205_v11  ;;  %v316_v10 = vld [vmem:[%s3263_s5 + $0x498] sm:$0xff]  ;;  %v237_v11 = vld [vmem:[%s3263_s5 + $0x220] sm:$0xff] }
  0x62   : > { %2996 = vmatprep.mubr.msk.f32.mxu1 %vm338_vm3, %v285_v12  ;;  %v317_v12 = vld [vmem:[%s3263_s5 + $0x4a0] sm:$0xff] }
  0x64   : > { %2877 = vmatmul.mubr.msk.f32.gmra.mrb[36].mxu0 %vm338_vm3, %v206_v13  ;;  %v238_v13 = vld [vmem:[%s3263_s5 + $0x228] sm:$0xff] }
  0x65   : > { %2997 = vmatmul.mubr.msk.f32.gmra.mrb[36].mxu1 %vm338_vm3, %v286_v14  ;;  %2879 = vmatprep.mubr.msk.f32.mxu0 %vm338_vm3, %v207_v15  ;;  %v318_v14 = vld [vmem:[%s3263_s5 + $0x4a8] sm:$0xff]  ;;  %v239_v15 = vld [vmem:[%s3263_s5 + $0x230] sm:$0xff] }
  0x66   : > { %2999 = vmatprep.mubr.msk.f32.mxu1 %vm338_vm3, %v287_v16  ;;  %v319_v16 = vld [vmem:[%s3263_s5 + $0x4b0] sm:$0xff] }
  0x68   : > { %2880 = vmatmul.mubr.msk.f32.gmra.mrb[38].mxu0 %vm338_vm3, %v208_v17  ;;  %v240_v17 = vld [vmem:[%s3263_s5 + $0x238] sm:$0xff] }
  0x69   : > { %3000 = vmatmul.mubr.msk.f32.gmra.mrb[38].mxu1 %vm338_vm3, %v288_v18  ;;  %2882 = vmatprep.mubr.msk.f32.mxu0 %vm338_vm3, %v209_v19  ;;  %v320_v18 = vld [vmem:[%s3263_s5 + $0x4b8] sm:$0xff]  ;;  %v241_v19 = vld [vmem:[%s3263_s5 + $0x240] sm:$0xff] }
  0x6a   : > { %3002 = vmatprep.mubr.msk.f32.mxu1 %vm338_vm3, %v289_v20  ;;  %v321_v20 = vld [vmem:[%s3263_s5 + $0x4c0] sm:$0xff] }
  0x6c   : > { %2883 = vmatmul.mubr.msk.f32.gmra.mrb[40].mxu0 %vm338_vm3, %v210_v21  ;;  %v242_v21 = vld [vmem:[%s3263_s5 + $0x248] sm:$0xff] }
  0x6d   : > { %3003 = vmatmul.mubr.msk.f32.gmra.mrb[40].mxu1 %vm338_vm3, %v290_v22  ;;  %2885 = vmatprep.mubr.msk.f32.mxu0 %vm338_vm3, %v211_v23  ;;  %v322_v22 = vld [vmem:[%s3263_s5 + $0x4c8] sm:$0xff]  ;;  %v243_v23 = vld [vmem:[%s3263_s5 + $0x250] sm:$0xff] }
  0x6e   : > { %3005 = vmatprep.mubr.msk.f32.mxu1 %vm338_vm3, %v291_v24  ;;  %v323_v24 = vld [vmem:[%s3263_s5 + $0x4d0] sm:$0xff] }
  0x70   : > { %2886 = vmatmul.mubr.msk.f32.gmra.mrb[42].mxu0 %vm338_vm3, %v212_v25  ;;  %v244_v25 = vld [vmem:[%s3263_s5 + $0x258] sm:$0xff] }
  0x71   : > { %3006 = vmatmul.mubr.msk.f32.gmra.mrb[42].mxu1 %vm338_vm3, %v292_v26  ;;  %2888 = vmatprep.mubr.msk.f32.mxu0 %vm338_vm3, %v213_v27  ;;  %v324_v26 = vld [vmem:[%s3263_s5 + $0x4d8] sm:$0xff]  ;;  %v245_v27 = vld [vmem:[%s3263_s5 + $0x260] sm:$0xff] }
  0x72   : > { %3008 = vmatprep.mubr.msk.f32.mxu1 %vm338_vm3, %v293_v28  ;;  %v325_v28 = vld [vmem:[%s3263_s5 + $0x4e0] sm:$0xff] }
  0x74   : > { %2889 = vmatmul.mubr.msk.f32.gmra.mrb[44].mxu0 %vm338_vm3, %v214_v29  ;;  %v246_v29 = vld [vmem:[%s3263_s5 + $0x268] sm:$0xff] }
  0x75   : > { %3009 = vmatmul.mubr.msk.f32.gmra.mrb[44].mxu1 %vm338_vm3, %v294_v30  ;;  %2891 = vmatprep.mubr.msk.f32.mxu0 %vm338_vm3, %v215_v31  ;;  %v326_v30 = vld [vmem:[%s3263_s5 + $0x4e8] sm:$0xff]  ;;  %v247_v31 = vld [vmem:[%s3263_s5 + $0x270] sm:$0xff] }
  0x76   : > { %3011 = vmatprep.mubr.msk.f32.mxu1 %vm338_vm3, %v295_v32  ;;  %v327_v32 = vld [vmem:[%s3263_s5 + $0x4f0] sm:$0xff] }
  0x78   : > { %2892 = vmatmul.mubr.msk.f32.gmra.mrb[46].mxu0 %vm338_vm3, %v216_v33  ;;  %v248_v33 = vld [vmem:[%s3263_s5 + $0x278] sm:$0xff] }
  0x79   : > { %3012 = vmatmul.mubr.msk.f32.gmra.mrb[46].mxu1 %vm338_vm3, %v296_v34  ;;  %2894 = vmatprep.mubr.msk.f32.mxu0 %vm338_vm3, %v217_v35  ;;  %v328_v34 = vld [vmem:[%s3263_s5 + $0x4f8] sm:$0xff] }
  0x7a   : > { %3014 = vmatprep.mubr.msk.f32.mxu1 %vm338_vm3, %v297_v36 }
  0x7c   : > { %2895 = vmatmul.mubr.msk.f32.gmra.mrb[48].mxu0 %vm338_vm3, %v218_v37 }
  0x7d   : > { %3015 = vmatmul.mubr.msk.f32.gmra.mrb[48].mxu1 %vm338_vm3, %v298_v38  ;;  %2897 = vmatprep.mubr.msk.f32.mxu0 %vm338_vm3, %v219_v39  ;;  %v3588_v39 = vld [vmem:[%s4331_s2] ss:$0 sm:$0xff] }
  0x7e   : > { %3017 = vmatprep.mubr.msk.f32.mxu1 %vm338_vm3, %v299_v40 }
  0x80   : > { %2898 = vmatmul.mubr.msk.f32.gmra.mrb[50].mxu0 %vm338_vm3, %v220_v41 }
  0x81   : > { %3018 = vmatmul.mubr.msk.f32.gmra.mrb[50].mxu1 %vm338_vm3, %v300_v42  ;;  %2900 = vmatprep.mubr.msk.f32.mxu0 %vm338_vm3, %v221_v43 }
  0x82   : > { %3020 = vmatprep.mubr.msk.f32.mxu1 %vm338_vm3, %v301_v44 }
  0x84   : > { %2901 = vmatmul.mubr.msk.f32.gmra.mrb[52].mxu0 %vm338_vm3, %v222_v45 }
  0x85   : > { %3021 = vmatmul.mubr.msk.f32.gmra.mrb[52].mxu1 %vm338_vm3, %v302_v46  ;;  %2903 = vmatprep.mubr.msk.f32.mxu0 %vm338_vm3, %v223_v47 }
  0x86   : > { %3023 = vmatprep.mubr.msk.f32.mxu1 %vm338_vm3, %v303_v48 }
  0x88   : > { %2904 = vmatmul.mubr.msk.f32.gmra.mrb[54].mxu0 %vm338_vm3, %v224_v49 }
  0x89   : > { %3024 = vmatmul.mubr.msk.f32.gmra.mrb[54].mxu1 %vm338_vm3, %v304_v50  ;;  %2906 = vmatprep.mubr.msk.f32.mxu0 %vm338_vm3, %v225_v51 }
  0x8a   : > { %3026 = vmatprep.mubr.msk.f32.mxu1 %vm338_vm3, %v305_v52 }
  0x8c   : > { %2907 = vmatmul.mubr.msk.f32.gmra.mrb[56].mxu0 %vm338_vm3, %v226_v53 }
  0x8d   : > { %3027 = vmatmul.mubr.msk.f32.gmra.mrb[56].mxu1 %vm338_vm3, %v306_v54  ;;  %2909 = vmatprep.mubr.msk.f32.mxu0 %vm338_vm3, %v227_v55 }
  0x8e   : > { %3029 = vmatprep.mubr.msk.f32.mxu1 %vm338_vm3, %v307_v56 }
  0x90   : > { %2910 = vmatmul.mubr.msk.f32.gmra.mrb[58].mxu0 %vm338_vm3, %v228_v57 }
  0x91   : > { %3030 = vmatmul.mubr.msk.f32.gmra.mrb[58].mxu1 %vm338_vm3, %v308_v58  ;;  %2912 = vmatprep.mubr.msk.f32.mxu0 %vm338_vm3, %v229_v59 }
  0x92   : > { %3032 = vmatprep.mubr.msk.f32.mxu1 %vm338_vm3, %v309_v60 }
  0x94   : > { %2913 = vmatmul.mubr.msk.f32.gmra.mrb[60].mxu0 %vm338_vm3, %v230_v61 }
  0x95   : > { %3033 = vmatmul.mubr.msk.f32.gmra.mrb[60].mxu1 %vm338_vm3, %v310_v62  ;;  %2915 = vmatprep.mubr.msk.f32.mxu0 %vm338_vm3, %v231_v63 }
  0x96   : > { %3035 = vmatprep.mubr.msk.f32.mxu1 %vm338_vm3, %v311_v0 }
  0x98   : > { %2916 = vmatmul.mubr.msk.f32.gmra.mrb[62].mxu0 %vm338_vm3, %v232_v1 }
  0x99   : > { %3036 = vmatmul.mubr.msk.f32.gmra.mrb[62].mxu1 %vm338_vm3, %v312_v2  ;;  %2918 = vmatprep.mubr.msk.f32.mxu0 %vm338_vm3, %v233_v3 }
  0x9a   : > { %3038 = vmatprep.mubr.msk.f32.mxu1 %vm338_vm3, %v313_v4 }
  0x9c   : > { %2919 = vmatmul.mubr.msk.f32.gmra.mrb[64].mxu0 %vm338_vm3, %v234_v5 }
  0x9d   : > { %3039 = vmatmul.mubr.msk.f32.gmra.mrb[64].mxu1 %vm338_vm3, %v314_v6  ;;  %2921 = vmatprep.mubr.msk.f32.mxu0 %vm338_vm3, %v235_v7 }
  0x9e   : > { %3041 = vmatprep.mubr.msk.f32.mxu1 %vm338_vm3, %v315_v8 }
  0xa0   : > { %2922 = vmatmul.mubr.msk.f32.gmra.mrb[66].mxu0 %vm338_vm3, %v236_v9 }
  0xa1   : > { %3042 = vmatmul.mubr.msk.f32.gmra.mrb[66].mxu1 %vm338_vm3, %v316_v10  ;;  %2924 = vmatprep.mubr.msk.f32.mxu0 %vm338_vm3, %v237_v11 }
  0xa2   : > { %3044 = vmatprep.mubr.msk.f32.mxu1 %vm338_vm3, %v317_v12 }
  0xa4   : > { %2925 = vmatmul.mubr.msk.f32.gmra.mrb[68].mxu0 %vm338_vm3, %v238_v13 }
  0xa5   : > { %3045 = vmatmul.mubr.msk.f32.gmra.mrb[68].mxu1 %vm338_vm3, %v318_v14  ;;  %2927 = vmatprep.mubr.msk.f32.mxu0 %vm338_vm3, %v239_v15 }
  0xa6   : > { %3047 = vmatprep.mubr.msk.f32.mxu1 %vm338_vm3, %v319_v16 }
  0xa8   : > { %2928 = vmatmul.mubr.msk.f32.gmra.mrb[70].mxu0 %vm338_vm3, %v240_v17 }
  0xa9   : > { %3048 = vmatmul.mubr.msk.f32.gmra.mrb[70].mxu1 %vm338_vm3, %v320_v18  ;;  %2930 = vmatprep.mubr.msk.f32.mxu0 %vm338_vm3, %v241_v19 }
  0xaa   : > { %3050 = vmatprep.mubr.msk.f32.mxu1 %vm338_vm3, %v321_v20 }
  0xac   : > { %2931 = vmatmul.mubr.msk.f32.gmra.mrb[72].mxu0 %vm338_vm3, %v242_v21 }
  0xad   : > { %3051 = vmatmul.mubr.msk.f32.gmra.mrb[72].mxu1 %vm338_vm3, %v322_v22  ;;  %2933 = vmatprep.mubr.msk.f32.mxu0 %vm338_vm3, %v243_v23 }
  0xae   : > { %3053 = vmatprep.mubr.msk.f32.mxu1 %vm338_vm3, %v323_v24 }
  0xb0   : > { %2934 = vmatmul.mubr.msk.f32.gmra.mrb[74].mxu0 %vm338_vm3, %v244_v25 }
  0xb1   : > { %3054 = vmatmul.mubr.msk.f32.gmra.mrb[74].mxu1 %vm338_vm3, %v324_v26  ;;  %2936 = vmatprep.mubr.msk.f32.mxu0 %vm338_vm3, %v245_v27 }
  0xb2   : > { %3056 = vmatprep.mubr.msk.f32.mxu1 %vm338_vm3, %v325_v28 }
  0xb4   : > { %2937 = vmatmul.mubr.msk.f32.gmra.mrb[76].mxu0 %vm338_vm3, %v246_v29 }
  0xb5   : > { %3057 = vmatmul.mubr.msk.f32.gmra.mrb[76].mxu1 %vm338_vm3, %v326_v30  ;;  %2939 = vmatprep.mubr.msk.f32.mxu0 %vm338_vm3, %v247_v31 }
  0xb6   : > { %3059 = vmatprep.mubr.msk.f32.mxu1 %vm338_vm3, %v327_v32 }
  0xb8   : > { %2940 = vmatmul.mubr.msk.f32.gmra.mrb[78].mxu0 %vm338_vm3, %v248_v33 }
  0xb9   : > { %3060 = vmatmul.mubr.msk.f32.gmra.mrb[78].mxu1 %vm338_vm3, %v328_v34 }
  0xef   : > { %v2824_v35 = vpop.f32.mrb[0].mxu0 }
  0xf0   : > { %v2944_v36 = vpop.f32.mrb[0].mxu1  ;;  %v889_v37 = vpop.f32.mrb[1].mxu0  ;;  %v895_v46 = vadd.f32 %v2824_v35, %v3588_v39 }
  0xf1   : > { %v1289_v38 = vpop.f32.mrb[1].mxu1  ;;  %v890_v44 = vadd.f32 %v3588_v39, %v889_v37  ;;  %v1295_v47 = vadd.f32 %v2944_v36, %v3588_v39 }
  0xf2   : > { %v1290_v45 = vadd.f32 %v3588_v39, %v1289_v38  ;;  %v1689_v62 = vmax.f32 %v895_v46, 0.0 }
  0xf3   : > { %v2827_v40 = vpop.f32.mrb[2].mxu0  ;;  %v1688_v54 = vmax.f32 %v890_v44, 0.0  ;;  %v1769_v63 = vmax.f32 %v1295_v47, 0.0 }
  0xf4   : > { %v2947_v41 = vpop.f32.mrb[2].mxu1  ;;  %v899_v42 = vpop.f32.mrb[3].mxu0  ;;  %v1768_v55 = vmax.f32 %v1290_v45, 0.0  ;;  %v3601_v0 = vadd.f32 %v2827_v40, %v3588_v39 }
  0xf5   : > { %v1299_v43 = vpop.f32.mrb[3].mxu1  ;;  %v900_v56 = vadd.f32 %v3588_v39, %v899_v42  ;;  %v3604_v1 = vadd.f32 %v2947_v41, %v3588_v39 }
  0xf6   : > { %v1300_v57 = vadd.f32 %v3588_v39, %v1299_v43  ;;  %v1691_v45 = vmax.f32 %v3601_v0, 0.0 }
  0xf7   : > { %v2830_v48 = vpop.f32.mrb[4].mxu0  ;;  %v1690_v10 = vmax.f32 %v900_v56, 0.0  ;;  %v1771_v46 = vmax.f32 %v3604_v1, 0.0 }
  0xf8   : > { %v2950_v49 = vpop.f32.mrb[4].mxu1  ;;  %v915_v50 = vadd.f32 %v2830_v48, %v3588_v39  ;;  %v909_v52 = vpop.f32.mrb[5].mxu0  ;;  %v1770_v11 = vmax.f32 %v1300_v57, 0.0 }
  0xf9   : > { %v1315_v51 = vadd.f32 %v2950_v49, %v3588_v39  ;;  %v1309_v53 = vpop.f32.mrb[5].mxu1  ;;  %v910_v60 = vadd.f32 %v3588_v39, %v909_v52 }
  0xfa   : > { %v1693_v58 = vmax.f32 %v915_v50, 0.0  ;;  %v1310_v61 = vadd.f32 %v3588_v39, %v1309_v53 }
  0xfb   : > { %v1773_v59 = vmax.f32 %v1315_v51, 0.0  ;;  %v2833_v2 = vpop.f32.mrb[6].mxu0  ;;  %v1692_v14 = vmax.f32 %v910_v60, 0.0 }
  0xfc   : > { %v2953_v3 = vpop.f32.mrb[6].mxu1  ;;  %v3606_v4 = vmax.f32 %v1688_v54, %v1693_v58  ;;  %v925_v6 = vadd.f32 %v2833_v2, %v3588_v39  ;;  %v919_v8 = vpop.f32.mrb[7].mxu0  ;;  %v1772_v15 = vmax.f32 %v1310_v61, 0.0 }
  0xfd   : > { %v3608_v5 = vmax.f32 %v1768_v55, %v1773_v59  ;;  %v1325_v7 = vadd.f32 %v2953_v3, %v3588_v39  ;;  %v1319_v9 = vpop.f32.mrb[7].mxu1  ;;  %v920_v12 = vadd.f32 %v3588_v39, %v919_v8 }
  0xfe   : > { %v1320_v13 = vadd.f32 %v3588_v39, %v1319_v9  ;;  %v1695_v16 = vmax.f32 %v925_v6, 0.0  ;;  %v2009_v18 = vrot.slane %v3606_v4, 1 }
  0xff   : > { %v1775_v17 = vmax.f32 %v1325_v7, 0.0  ;;  %v2088_v19 = vrot.slane %v3608_v5, 1  ;;  %v1694_v20 = vmax.f32 %v920_v12, 0.0  ;;  %v2836_v22 = vpop.f32.mrb[8].mxu0 }
 0x100   : > { %v1774_v21 = vmax.f32 %v1320_v13, 0.0  ;;  %v2956_v23 = vpop.f32.mrb[8].mxu1  ;;  %v3617_v24 = vmax.f32 %v1690_v10, %v1695_v16  ;;  %v935_v26 = vadd.f32 %v2836_v22, %v3588_v39  ;;  %v929_v28 = vpop.f32.mrb[9].mxu0 }
 0x101   : > { %v3619_v25 = vmax.f32 %v1770_v11, %v1775_v17  ;;  %v1335_v27 = vadd.f32 %v2956_v23, %v3588_v39  ;;  %v1329_v29 = vpop.f32.mrb[9].mxu1  ;;  %v1849_v30 = vmax.f32 %v1689_v62, %v1694_v20  ;;  %v930_v32 = vadd.f32 %v3588_v39, %v929_v28 }
 0x102   : > { %v1889_v31 = vmax.f32 %v1769_v63, %v1774_v21  ;;  %v1330_v33 = vadd.f32 %v3588_v39, %v1329_v29  ;;  %v2012_v34 = vrot.slane %v3617_v24, 1  ;;  %v1697_v36 = vmax.f32 %v935_v26, 0.0 }
 0x103   : > { %v2092_v35 = vrot.slane %v3619_v25, 1  ;;  %v1777_v37 = vmax.f32 %v1335_v27, 0.0  ;;  %v2010_v38 = vrot.slane %v1849_v30, 1  ;;  %v1696_v41 = vmax.f32 %v930_v32, 0.0  ;;  %v2839_v43 = vpop.f32.mrb[10].mxu0 }
 0x104   : > { %v2090_v40 = vrot.slane %v1889_v31, 1  ;;  %v1776_v42 = vmax.f32 %v1330_v33, 0.0  ;;  %v2959_v44 = vpop.f32.mrb[10].mxu1  ;;  %v3633_v47 = vmax.f32 %v1692_v14, %v1697_v36  ;;  %v939_v49 = vpop.f32.mrb[11].mxu0  ;;  %v3659_v6 = vadd.f32 %v2839_v43, %v3588_v39 }
 0x105   : > { %v3635_v48 = vmax.f32 %v1772_v15, %v1777_v37  ;;  %v1339_v50 = vpop.f32.mrb[11].mxu1  ;;  %v2011_v51 = vsel %vm2008_vm4, %v2009_v18, %v2010_v38  ;;  %v2013_v52 = vsel %vm2008_vm4, %v2010_v38, %v2012_v34  ;;  %v1851_v61 = vmax.f32 %v1691_v45, %v1696_v41 }
 0x106   : > { %v2091_v53 = vsel %vm2008_vm4, %v2088_v19, %v2090_v40  ;;  %v2093_v54 = vsel %vm2008_vm4, %v2090_v40, %v2092_v35  ;;  %v2249_v55 = vmax.f32 %v3606_v4, %v2011_v51  ;;  %v2250_v56 = vmax.f32 %v1849_v30, %v2013_v52 }
 0x107   : > { %v2289_v57 = vmax.f32 %v3608_v5, %v2091_v53  ;;  %v2290_v58 = vmax.f32 %v1889_v31, %v2093_v54  ;;  %v2016_v59 = vrot.slane %v3633_v47, 1  ;;  %v2096_v60 = vrot.slane %v3635_v48, 1  ;;  %v2842_v63 = vpop.f32.mrb[12].mxu0 }
 0x108   : > { %v1891_v62 = vmax.f32 %v1771_v46, %v1776_v42  ;;  %v2962_v0 = vpop.f32.mrb[12].mxu1  ;;  %2330 = vst.msk [vmem:[%s3648_s10] sm:$0xff] %vm2329_vm5, %v2249_v55  ;;  %2331 = vst.msk [vmem:[%s3648_s10 + $0x8] sm:$0xff] %vm2329_vm5, %v2250_v56  ;;  %v949_v1 = vpop.f32.mrb[13].mxu0  ;;  %v2014_v3 = vrot.slane %v1851_v61, 1  ;;  %v3662_v7 = vadd.f32 %v2959_v44, %v3588_v39  ;;  %v940_v8 = vadd.f32 %v3588_v39, %v939_v49 }
 0x109   : > { %2370 = vst.msk [vmem:[%s3648_s10 + $0x140] sm:$0xff] %vm2329_vm5, %v2289_v57  ;;  %2371 = vst.msk [vmem:[%s3648_s10 + $0x148] sm:$0xff] %vm2329_vm5, %v2290_v58  ;;  %v1349_v2 = vpop.f32.mrb[13].mxu1  ;;  %v1340_v9 = vadd.f32 %v3588_v39, %v1339_v50  ;;  %v950_v10 = vadd.f32 %v3588_v39, %v949_v1  ;;  %v1699_v27 = vmax.f32 %v3659_v6, 0.0  ;;  %v3693_v33 = vadd.f32 %v2842_v63, %v3588_v39 }
 0x10a   : > { %v2094_v4 = vrot.slane %v1891_v62, 1  ;;  %v1350_v11 = vadd.f32 %v3588_v39, %v1349_v2  ;;  %v2015_v12 = vsel %vm2008_vm4, %v2012_v34, %v2014_v3  ;;  %v2017_v13 = vsel %vm2008_vm4, %v2014_v3, %v2016_v59 }
 0x10b   : > { %v2845_v16 = vpop.f32.mrb[14].mxu0  ;;  %v2251_v18 = vmax.f32 %v3617_v24, %v2015_v12  ;;  %v2252_v20 = vmax.f32 %v1851_v61, %v2017_v13  ;;  %v1779_v28 = vmax.f32 %v3662_v7, 0.0  ;;  %v1698_v31 = vmax.f32 %v940_v8, 0.0 }
 0x10c   : > { %v2095_v14 = vsel %vm2008_vm4, %v2092_v35, %v2094_v4  ;;  %v2097_v15 = vsel %vm2008_vm4, %v2094_v4, %v2096_v60  ;;  %v2965_v17 = vpop.f32.mrb[14].mxu1  ;;  %v959_v23 = vpop.f32.mrb[15].mxu0  ;;  %v965_v24 = vadd.f32 %v2845_v16, %v3588_v39  ;;  %v1778_v32 = vmax.f32 %v1340_v9, 0.0 }
 0x10d   : > { %v2291_v21 = vmax.f32 %v3619_v25, %v2095_v14  ;;  %v2292_v22 = vmax.f32 %v1891_v62, %v2097_v15  ;;  %v1359_v26 = vpop.f32.mrb[15].mxu1  ;;  %2332 = vst.msk [vmem:[%s3648_s10 + $0x10] sm:$0xff] %vm2329_vm5, %v2251_v18  ;;  %2333 = vst.msk [vmem:[%s3648_s10 + $0x18] sm:$0xff] %vm2329_vm5, %v2252_v20  ;;  %v1365_v29 = vadd.f32 %v2965_v17, %v3588_v39  ;;  %v1700_v37 = vmax.f32 %v950_v10, 0.0 }
 0x10e   : > { %v960_v25 = vadd.f32 %v3588_v39, %v959_v23  ;;  %v1360_v30 = vadd.f32 %v3588_v39, %v1359_v26  ;;  %v3696_v34 = vadd.f32 %v2962_v0, %v3588_v39  ;;  %v1780_v38 = vmax.f32 %v1350_v11, 0.0 }
 0x10f   : > { %2372 = vst.msk [vmem:[%s3648_s10 + $0x150] sm:$0xff] %vm2329_vm5, %v2291_v21  ;;  %2373 = vst.msk [vmem:[%s3648_s10 + $0x158] sm:$0xff] %vm2329_vm5, %v2292_v22  ;;  %v2848_v35 = vpop.f32.mrb[16].mxu0  ;;  %v1703_v40 = vmax.f32 %v965_v24, 0.0  ;;  %v1783_v41 = vmax.f32 %v1365_v29, 0.0 }
 0x110   : > { %v2968_v36 = vpop.f32.mrb[16].mxu1  ;;  %v969_v42 = vpop.f32.mrb[17].mxu0  ;;  %v975_v44 = vadd.f32 %v2848_v35, %v3588_v39  ;;  %v1702_v52 = vmax.f32 %v960_v25, 0.0  ;;  %v1782_v53 = vmax.f32 %v1360_v30, 0.0 }
 0x111   : > { %v1369_v43 = vpop.f32.mrb[17].mxu1  ;;  %v1375_v45 = vadd.f32 %v2968_v36, %v3588_v39  ;;  %v970_v46 = vadd.f32 %v3588_v39, %v969_v42  ;;  %v1853_v50 = vmax.f32 %v1698_v31, %v1703_v40  ;;  %v1893_v51 = vmax.f32 %v1778_v32, %v1783_v41 }
 0x112   : > { %v1370_v49 = vadd.f32 %v3588_v39, %v1369_v43  ;;  %v1705_v54 = vmax.f32 %v975_v44, 0.0  ;;  %v1781_v40 = vmax.f32 %v3696_v34, 0.0 }
 0x113   : > { %v1785_v55 = vmax.f32 %v1375_v45, 0.0  ;;  %v1704_v56 = vmax.f32 %v970_v46, 0.0  ;;  %v2851_v58 = vpop.f32.mrb[18].mxu0  ;;  %v2018_v62 = vrot.slane %v1853_v50, 1  ;;  %v2098_v63 = vrot.slane %v1893_v51, 1 }
 0x114   : > { %v1784_v57 = vmax.f32 %v1370_v49, 0.0  ;;  %v2971_v61 = vpop.f32.mrb[18].mxu1  ;;  %v985_v0 = vadd.f32 %v2851_v58, %v3588_v39  ;;  %v979_v2 = vpop.f32.mrb[19].mxu0  ;;  %v3704_v4 = vmax.f32 %v1700_v37, %v1705_v54 }
 0x115   : > { %v1385_v1 = vadd.f32 %v2971_v61, %v3588_v39  ;;  %v1379_v3 = vpop.f32.mrb[19].mxu1  ;;  %v3706_v6 = vmax.f32 %v1780_v38, %v1785_v55  ;;  %v1854_v7 = vmax.f32 %v1699_v27, %v1704_v56  ;;  %v2019_v9 = vsel %vm2008_vm4, %v2016_v59, %v2018_v62 }
 0x116   : > { %v1894_v8 = vmax.f32 %v1779_v28, %v1784_v57  ;;  %v2099_v10 = vsel %vm2008_vm4, %v2096_v60, %v2098_v63  ;;  %v1707_v11 = vmax.f32 %v985_v0, 0.0  ;;  %v2253_v13 = vmax.f32 %v3633_v47, %v2019_v9 }
 0x117   : > { %v1787_v12 = vmax.f32 %v1385_v1, 0.0  ;;  %v2293_v14 = vmax.f32 %v3635_v48, %v2099_v10  ;;  %v2022_v15 = vrot.slane %v3704_v4, 1  ;;  %v2102_v16 = vrot.slane %v3706_v6, 1  ;;  %v2854_v17 = vpop.f32.mrb[20].mxu0 }
 0x118   : > { %v2974_v18 = vpop.f32.mrb[20].mxu1  ;;  %v2020_v20 = vrot.slane %v1854_v7, 1  ;;  %v2100_v59 = vrot.slane %v1894_v8, 1  ;;  %v3718_v21 = vmax.f32 %v1702_v52, %v1707_v11  ;;  %v989_v60 = vpop.f32.mrb[21].mxu0  ;;  %2334 = vst.msk [vmem:[%s3648_s10 + $0x20] sm:$0xff] %vm2329_vm5, %v2253_v13  ;;  %v980_v47 = vadd.f32 %v3588_v39, %v979_v2 }
 0x119   : > { %v3720_v22 = vmax.f32 %v1782_v53, %v1787_v12  ;;  %v1389_v23 = vpop.f32.mrb[21].mxu1  ;;  %2374 = vst.msk [vmem:[%s3648_s10 + $0x160] sm:$0xff] %vm2329_vm5, %v2293_v14  ;;  %v1380_v48 = vadd.f32 %v3588_v39, %v1379_v3  ;;  %v3729_v26 = vadd.f32 %v2854_v17, %v3588_v39  ;;  %v3732_v27 = vadd.f32 %v2974_v18, %v3588_v39 }
 0x11a   : > { %v2021_v28 = vsel %vm2008_vm4, %v2018_v62, %v2020_v20  ;;  %v2023_v24 = vsel %vm2008_vm4, %v2020_v20, %v2022_v15  ;;  %v2101_v29 = vsel %vm2008_vm4, %v2098_v63, %v2100_v59  ;;  %v2103_v25 = vsel %vm2008_vm4, %v2100_v59, %v2102_v16 }
 0x11b   : > { %v2254_v30 = vmax.f32 %v1853_v50, %v2021_v28  ;;  %v2255_v31 = vmax.f32 %v1854_v7, %v2023_v24  ;;  %v2294_v32 = vmax.f32 %v1893_v51, %v2101_v29  ;;  %v2295_v35 = vmax.f32 %v1894_v8, %v2103_v25  ;;  %v2857_v36 = vpop.f32.mrb[22].mxu0 }
 0x11c   : > { %v2977_v37 = vpop.f32.mrb[22].mxu1  ;;  %v1701_v38 = vmax.f32 %v3693_v33, 0.0  ;;  %v1706_v41 = vmax.f32 %v980_v47, 0.0  ;;  %v1786_v42 = vmax.f32 %v1380_v48, 0.0  ;;  %v999_v43 = vpop.f32.mrb[23].mxu0  ;;  %v2026_v45 = vrot.slane %v3718_v21, 1 }
 0x11d   : > { %v1399_v44 = vpop.f32.mrb[23].mxu1  ;;  %2335 = vst.msk [vmem:[%s3648_s10 + $0x28] sm:$0xff] %vm2329_vm5, %v2254_v30  ;;  %2336 = vst.msk [vmem:[%s3648_s10 + $0x30] sm:$0xff] %vm2329_vm5, %v2255_v31  ;;  %v2106_v46 = vrot.slane %v3720_v22, 1  ;;  %v990_v33 = vadd.f32 %v3588_v39, %v989_v60  ;;  %v1390_v34 = vadd.f32 %v3588_v39, %v1389_v23  ;;  %v1709_v51 = vmax.f32 %v3729_v26, 0.0 }
 0x11e   : > { %2375 = vst.msk [vmem:[%s3648_s10 + $0x168] sm:$0xff] %vm2329_vm5, %v2294_v32  ;;  %2376 = vst.msk [vmem:[%s3648_s10 + $0x170] sm:$0xff] %vm2329_vm5, %v2295_v35  ;;  %v1856_v49 = vmax.f32 %v1701_v38, %v1706_v41  ;;  %v1896_v50 = vmax.f32 %v1781_v40, %v1786_v42  ;;  %v1789_v52 = vmax.f32 %v3732_v27, 0.0  ;;  %v3755_v53 = vadd.f32 %v2857_v36, %v3588_v39 }
 0x11f   : > { %v3758_v54 = vadd.f32 %v2977_v37, %v3588_v39  ;;  %v1000_v55 = vadd.f32 %v3588_v39, %v999_v43  ;;  %v1400_v56 = vadd.f32 %v3588_v39, %v1399_v44  ;;  %v2860_v57 = vpop.f32.mrb[24].mxu0  ;;  %v1708_v63 = vmax.f32 %v990_v33, 0.0 }
 0x120   : > { %v2980_v58 = vpop.f32.mrb[24].mxu1  ;;  %v2024_v61 = vrot.slane %v1856_v49, 1  ;;  %v2104_v62 = vrot.slane %v1896_v50, 1  ;;  %v1788_v0 = vmax.f32 %v1390_v34, 0.0  ;;  %v1009_v1 = vpop.f32.mrb[25].mxu0  ;;  %v1015_v8 = vadd.f32 %v2860_v57, %v3588_v39 }
 0x121   : > { %v1409_v2 = vpop.f32.mrb[25].mxu1  ;;  %v1710_v3 = vmax.f32 %v1000_v55, 0.0  ;;  %v1790_v7 = vmax.f32 %v1400_v56, 0.0  ;;  %v1415_v9 = vadd.f32 %v2980_v58, %v3588_v39  ;;  %v1010_v47 = vadd.f32 %v3588_v39, %v1009_v1 }
 0x122   : > { %v2025_v10 = vsel %vm2008_vm4, %v2022_v15, %v2024_v61  ;;  %v2027_v11 = vsel %vm2008_vm4, %v2024_v61, %v2026_v45  ;;  %v2105_v12 = vsel %vm2008_vm4, %v2102_v16, %v2104_v62  ;;  %v2107_v13 = vsel %vm2008_vm4, %v2104_v62, %v2106_v46 }
 0x123   : > { %v2256_v14 = vmax.f32 %v3704_v4, %v2025_v10  ;;  %v2257_v17 = vmax.f32 %v1856_v49, %v2027_v11  ;;  %v2296_v18 = vmax.f32 %v3706_v6, %v2105_v12  ;;  %v2297_v15 = vmax.f32 %v1896_v50, %v2107_v13  ;;  %v2863_v20 = vpop.f32.mrb[26].mxu0 }
 0x124   : > { %v2983_v59 = vpop.f32.mrb[26].mxu1  ;;  %v1713_v60 = vmax.f32 %v1015_v8, 0.0  ;;  %v1793_v23 = vmax.f32 %v1415_v9, 0.0  ;;  %v1410_v16 = vadd.f32 %v3588_v39, %v1409_v2  ;;  %v1019_v48 = vpop.f32.mrb[27].mxu0  ;;  %v1025_v4 = vadd.f32 %v2863_v20, %v3588_v39 }
 0x125   : > { %v1419_v26 = vpop.f32.mrb[27].mxu1  ;;  %2337 = vst.msk [vmem:[%s3648_s10 + $0x38] sm:$0xff] %vm2329_vm5, %v2256_v14  ;;  %2338 = vst.msk [vmem:[%s3648_s10 + $0x40] sm:$0xff] %vm2329_vm5, %v2257_v17  ;;  %v1425_v6 = vadd.f32 %v2983_v59, %v3588_v39  ;;  %v1020_v27 = vadd.f32 %v3588_v39, %v1019_v48  ;;  %v1712_v25 = vmax.f32 %v1010_v47, 0.0  ;;  %v1791_v47 = vmax.f32 %v3758_v54, 0.0 }
 0x126   : > { %2377 = vst.msk [vmem:[%s3648_s10 + $0x178] sm:$0xff] %vm2329_vm5, %v2296_v18  ;;  %2378 = vst.msk [vmem:[%s3648_s10 + $0x180] sm:$0xff] %vm2329_vm5, %v2297_v15  ;;  %v1420_v28 = vadd.f32 %v3588_v39, %v1419_v26  ;;  %v1858_v24 = vmax.f32 %v1708_v63, %v1713_v60  ;;  %v1898_v29 = vmax.f32 %v1788_v0, %v1793_v23  ;;  %v1792_v30 = vmax.f32 %v1410_v16, 0.0 }
 0x127   : > { %v1715_v31 = vmax.f32 %v1025_v4, 0.0  ;;  %v1795_v32 = vmax.f32 %v1425_v6, 0.0  ;;  %v1714_v35 = vmax.f32 %v1020_v27, 0.0  ;;  %v2866_v37 = vpop.f32.mrb[28].mxu0  ;;  %v1711_v23 = vmax.f32 %v3755_v53, 0.0 }
 0x128   : > { %v1794_v36 = vmax.f32 %v1420_v28, 0.0  ;;  %v2986_v38 = vpop.f32.mrb[28].mxu1  ;;  %v2028_v40 = vrot.slane %v1858_v24, 1  ;;  %v2108_v41 = vrot.slane %v1898_v29, 1  ;;  %v1035_v42 = vadd.f32 %v2866_v37, %v3588_v39  ;;  %v1029_v44 = vpop.f32.mrb[29].mxu0 }
 0x129   : > { %v1435_v43 = vadd.f32 %v2986_v38, %v3588_v39  ;;  %v1429_v33 = vpop.f32.mrb[29].mxu1  ;;  %v3790_v34 = vmax.f32 %v1710_v3, %v1715_v31  ;;  %v3792_v49 = vmax.f32 %v1790_v7, %v1795_v32  ;;  %v1859_v50 = vmax.f32 %v1709_v51, %v1714_v35 }
 0x12a   : > { %v1899_v55 = vmax.f32 %v1789_v52, %v1794_v36  ;;  %v2029_v56 = vsel %vm2008_vm4, %v2026_v45, %v2028_v40  ;;  %v2109_v57 = vsel %vm2008_vm4, %v2106_v46, %v2108_v41  ;;  %v1717_v58 = vmax.f32 %v1035_v42, 0.0 }
 0x12b   : > { %v1797_v61 = vmax.f32 %v1435_v43, 0.0  ;;  %v2258_v62 = vmax.f32 %v3718_v21, %v2029_v56  ;;  %v2298_v63 = vmax.f32 %v3720_v22, %v2109_v57  ;;  %v2032_v0 = vrot.slane %v3790_v34, 1  ;;  %v2869_v52 = vpop.f32.mrb[30].mxu0 }
 0x12c   : > { %v2112_v51 = vrot.slane %v3792_v49, 1  ;;  %v2989_v1 = vpop.f32.mrb[30].mxu1  ;;  %v2030_v2 = vrot.slane %v1859_v50, 1  ;;  %v2110_v45 = vrot.slane %v1899_v55, 1  ;;  %v3804_v3 = vmax.f32 %v1712_v25, %v1717_v58  ;;  %v1039_v46 = vpop.f32.mrb[31].mxu0 }
 0x12d   : > { %v3806_v7 = vmax.f32 %v1792_v30, %v1797_v61  ;;  %v1439_v8 = vpop.f32.mrb[31].mxu1  ;;  %2339 = vst.msk [vmem:[%s3648_s10 + $0x48] sm:$0xff] %vm2329_vm5, %v2258_v62  ;;  %2379 = vst.msk [vmem:[%s3648_s10 + $0x188] sm:$0xff] %vm2329_vm5, %v2298_v63  ;;  %v1030_v21 = vadd.f32 %v3588_v39, %v1029_v44  ;;  %v1430_v22 = vadd.f32 %v3588_v39, %v1429_v33 }
 0x12e   : > { %v3815_v9 = vadd.f32 %v2869_v52, %v3588_v39  ;;  %v3818_v10 = vadd.f32 %v2989_v1, %v3588_v39  ;;  %v2031_v11 = vsel %vm2008_vm4, %v2028_v40, %v2030_v2  ;;  %v2033_v12 = vsel %vm2008_vm4, %v2030_v2, %v2032_v0 }
 0x12f   : > { %v2111_v13 = vsel %vm2008_vm4, %v2108_v41, %v2110_v45  ;;  %v2113_v14 = vsel %vm2008_vm4, %v2110_v45, %v2112_v51  ;;  %v2259_v17 = vmax.f32 %v1858_v24, %v2031_v11  ;;  %v2260_v18 = vmax.f32 %v1859_v50, %v2033_v12  ;;  %v2872_v59 = vpop.f32.mrb[32].mxu0 }
 0x130   : > { %v2299_v15 = vmax.f32 %v1898_v29, %v2111_v13  ;;  %v2300_v20 = vmax.f32 %v1899_v55, %v2113_v14  ;;  %v2992_v60 = vpop.f32.mrb[32].mxu1  ;;  %v1716_v16 = vmax.f32 %v1030_v21, 0.0  ;;  %v1796_v48 = vmax.f32 %v1430_v22, 0.0  ;;  %v1049_v26 = vpop.f32.mrb[33].mxu0 }
 0x131   : > { %v1449_v4 = vpop.f32.mrb[33].mxu1  ;;  %2340 = vst.msk [vmem:[%s3648_s10 + $0x50] sm:$0xff] %vm2329_vm5, %v2259_v17  ;;  %2341 = vst.msk [vmem:[%s3648_s10 + $0x58] sm:$0xff] %vm2329_vm5, %v2260_v18  ;;  %v2036_v6 = vrot.slane %v3804_v3, 1  ;;  %v2116_v27 = vrot.slane %v3806_v7, 1  ;;  %v1040_v53 = vadd.f32 %v3588_v39, %v1039_v46  ;;  %v1440_v54 = vadd.f32 %v3588_v39, %v1439_v8 }
 0x132   : > { %2380 = vst.msk [vmem:[%s3648_s10 + $0x190] sm:$0xff] %vm2329_vm5, %v2299_v15  ;;  %2381 = vst.msk [vmem:[%s3648_s10 + $0x198] sm:$0xff] %vm2329_vm5, %v2300_v20  ;;  %v1861_v28 = vmax.f32 %v1711_v23, %v1716_v16  ;;  %v1901_v24 = vmax.f32 %v1791_v47, %v1796_v48  ;;  %v1719_v29 = vmax.f32 %v3815_v9, 0.0  ;;  %v1799_v25 = vmax.f32 %v3818_v10, 0.0 }
 0x133   : > { %v3841_v30 = vadd.f32 %v2872_v59, %v3588_v39  ;;  %v3844_v31 = vadd.f32 %v2992_v60, %v3588_v39  ;;  %v1050_v32 = vadd.f32 %v3588_v39, %v1049_v26  ;;  %v1450_v35 = vadd.f32 %v3588_v39, %v1449_v4  ;;  %v2875_v36 = vpop.f32.mrb[34].mxu0 }
 0x134   : > { %v2995_v37 = vpop.f32.mrb[34].mxu1  ;;  %v2034_v38 = vrot.slane %v1861_v28, 1  ;;  %v2114_v40 = vrot.slane %v1901_v24, 1  ;;  %v1718_v41 = vmax.f32 %v1040_v53, 0.0  ;;  %v1798_v42 = vmax.f32 %v1440_v54, 0.0  ;;  %v1059_v43 = vpop.f32.mrb[35].mxu0 }
 0x135   : > { %v1459_v44 = vpop.f32.mrb[35].mxu1  ;;  %v1720_v33 = vmax.f32 %v1050_v32, 0.0  ;;  %v1800_v50 = vmax.f32 %v1450_v35, 0.0  ;;  %v1065_v55 = vadd.f32 %v2875_v36, %v3588_v39  ;;  %v1465_v56 = vadd.f32 %v2995_v37, %v3588_v39 }
 0x136   : > { %v2035_v57 = vsel %vm2008_vm4, %v2032_v0, %v2034_v38  ;;  %v2037_v58 = vsel %vm2008_vm4, %v2034_v38, %v2036_v6  ;;  %v2115_v61 = vsel %vm2008_vm4, %v2112_v51, %v2114_v40  ;;  %v2117_v62 = vsel %vm2008_vm4, %v2114_v40, %v2116_v27 }
 0x137   : > { %v2261_v63 = vmax.f32 %v3790_v34, %v2035_v57  ;;  %v2262_v52 = vmax.f32 %v1861_v28, %v2037_v58  ;;  %v2301_v1 = vmax.f32 %v3792_v49, %v2115_v61  ;;  %v2302_v0 = vmax.f32 %v1901_v24, %v2117_v62  ;;  %v2878_v2 = vpop.f32.mrb[36].mxu0 }
 0x138   : > { %v2998_v45 = vpop.f32.mrb[36].mxu1  ;;  %v1723_v46 = vmax.f32 %v1065_v55, 0.0  ;;  %v1803_v8 = vmax.f32 %v1465_v56, 0.0  ;;  %v1060_v21 = vadd.f32 %v3588_v39, %v1059_v43  ;;  %v1460_v51 = vadd.f32 %v3588_v39, %v1459_v44  ;;  %v1069_v22 = vpop.f32.mrb[37].mxu0 }
 0x139   : > { %v1469_v9 = vpop.f32.mrb[37].mxu1  ;;  %2342 = vst.msk [vmem:[%s3648_s10 + $0x60] sm:$0xff] %vm2329_vm5, %v2261_v63  ;;  %2343 = vst.msk [vmem:[%s3648_s10 + $0x68] sm:$0xff] %vm2329_vm5, %v2262_v52  ;;  %v1075_v34 = vadd.f32 %v2878_v2, %v3588_v39  ;;  %v1475_v49 = vadd.f32 %v2998_v45, %v3588_v39  ;;  %v1070_v10 = vadd.f32 %v3588_v39, %v1069_v22 }
 0x13a   : > { %2382 = vst.msk [vmem:[%s3648_s10 + $0x1a0] sm:$0xff] %vm2329_vm5, %v2301_v1  ;;  %2383 = vst.msk [vmem:[%s3648_s10 + $0x1a8] sm:$0xff] %vm2329_vm5, %v2302_v0  ;;  %v1470_v11 = vadd.f32 %v3588_v39, %v1469_v9  ;;  %v1863_v12 = vmax.f32 %v1718_v41, %v1723_v46  ;;  %v1903_v13 = vmax.f32 %v1798_v42, %v1803_v8  ;;  %v1722_v14 = vmax.f32 %v1060_v21, 0.0 }
 0x13b   : > { %v1802_v17 = vmax.f32 %v1460_v51, 0.0  ;;  %v1725_v18 = vmax.f32 %v1075_v34, 0.0  ;;  %v1805_v15 = vmax.f32 %v1475_v49, 0.0  ;;  %v1724_v20 = vmax.f32 %v1070_v10, 0.0  ;;  %v2881_v60 = vpop.f32.mrb[38].mxu0 }
 0x13c   : > { %v1804_v59 = vmax.f32 %v1470_v11, 0.0  ;;  %v3001_v23 = vpop.f32.mrb[38].mxu1  ;;  %v2038_v47 = vrot.slane %v1863_v12, 1  ;;  %v2118_v16 = vrot.slane %v1903_v13, 1  ;;  %v1085_v48 = vadd.f32 %v2881_v60, %v3588_v39  ;;  %v1079_v4 = vpop.f32.mrb[39].mxu0 }
 0x13d   : > { %v1485_v26 = vadd.f32 %v3001_v23, %v3588_v39  ;;  %v1479_v53 = vpop.f32.mrb[39].mxu1  ;;  %v3876_v54 = vmax.f32 %v1720_v33, %v1725_v18  ;;  %v3878_v28 = vmax.f32 %v1800_v50, %v1805_v15  ;;  %v1864_v24 = vmax.f32 %v1719_v29, %v1724_v20 }
 0x13e   : > { %v1904_v32 = vmax.f32 %v1799_v25, %v1804_v59  ;;  %v2039_v35 = vsel %vm2008_vm4, %v2036_v6, %v2038_v47  ;;  %v2119_v36 = vsel %vm2008_vm4, %v2116_v27, %v2118_v16  ;;  %v1727_v37 = vmax.f32 %v1085_v48, 0.0 }
 0x13f   : > { %v1807_v38 = vmax.f32 %v1485_v26, 0.0  ;;  %v2263_v40 = vmax.f32 %v3804_v3, %v2039_v35  ;;  %v2303_v41 = vmax.f32 %v3806_v7, %v2119_v36  ;;  %v2042_v42 = vrot.slane %v3876_v54, 1  ;;  %v2884_v25 = vpop.f32.mrb[40].mxu0 }
 0x140   : > { %v2122_v29 = vrot.slane %v3878_v28, 1  ;;  %v3004_v43 = vpop.f32.mrb[40].mxu1  ;;  %v2040_v44 = vrot.slane %v1864_v24, 1  ;;  %v2120_v6 = vrot.slane %v1904_v32, 1  ;;  %v3890_v33 = vmax.f32 %v1722_v14, %v1727_v37  ;;  %v1089_v27 = vpop.f32.mrb[41].mxu0 }
 0x141   : > { %v3892_v50 = vmax.f32 %v1802_v17, %v1807_v38  ;;  %v1489_v55 = vpop.f32.mrb[41].mxu1  ;;  %2344 = vst.msk [vmem:[%s3648_s10 + $0x70] sm:$0xff] %vm2329_vm5, %v2263_v40  ;;  %2384 = vst.msk [vmem:[%s3648_s10 + $0x1b0] sm:$0xff] %vm2329_vm5, %v2303_v41  ;;  %v1080_v3 = vadd.f32 %v3588_v39, %v1079_v4  ;;  %v1480_v7 = vadd.f32 %v3588_v39, %v1479_v53  ;;  %v1721_v8 = vmax.f32 %v3841_v30, 0.0 }
 0x142   : > { %v3901_v56 = vadd.f32 %v2884_v25, %v3588_v39  ;;  %v3904_v57 = vadd.f32 %v3004_v43, %v3588_v39  ;;  %v2041_v58 = vsel %vm2008_vm4, %v2038_v47, %v2040_v44  ;;  %v2043_v61 = vsel %vm2008_vm4, %v2040_v44, %v2042_v42 }
 0x143   : > { %v2121_v62 = vsel %vm2008_vm4, %v2118_v16, %v2120_v6  ;;  %v2123_v63 = vsel %vm2008_vm4, %v2120_v6, %v2122_v29  ;;  %v2264_v52 = vmax.f32 %v1863_v12, %v2041_v58  ;;  %v2265_v1 = vmax.f32 %v1864_v24, %v2043_v61  ;;  %v2887_v45 = vpop.f32.mrb[42].mxu0 }
 0x144   : > { %v2304_v0 = vmax.f32 %v1903_v13, %v2121_v62  ;;  %v2305_v2 = vmax.f32 %v1904_v32, %v2123_v63  ;;  %v3007_v46 = vpop.f32.mrb[42].mxu1  ;;  %v1801_v21 = vmax.f32 %v3844_v31, 0.0  ;;  %v1726_v51 = vmax.f32 %v1080_v3, 0.0  ;;  %v1099_v9 = vpop.f32.mrb[43].mxu0 }
 0x145   : > { %v1806_v22 = vmax.f32 %v1480_v7, 0.0  ;;  %v1499_v34 = vpop.f32.mrb[43].mxu1  ;;  %2345 = vst.msk [vmem:[%s3648_s10 + $0x78] sm:$0xff] %vm2329_vm5, %v2264_v52  ;;  %2346 = vst.msk [vmem:[%s3648_s10 + $0x80] sm:$0xff] %vm2329_vm5, %v2265_v1  ;;  %v2046_v49 = vrot.slane %v3890_v33, 1  ;;  %v2126_v10 = vrot.slane %v3892_v50, 1  ;;  %v1090_v30 = vadd.f32 %v3588_v39, %v1089_v27 }
 0x146   : > { %2385 = vst.msk [vmem:[%s3648_s10 + $0x1b8] sm:$0xff] %vm2329_vm5, %v2304_v0  ;;  %2386 = vst.msk [vmem:[%s3648_s10 + $0x1c0] sm:$0xff] %vm2329_vm5, %v2305_v2  ;;  %v1490_v31 = vadd.f32 %v3588_v39, %v1489_v55  ;;  %v1866_v11 = vmax.f32 %v1721_v8, %v1726_v51  ;;  %v1729_v13 = vmax.f32 %v3901_v56, 0.0  ;;  %v1809_v14 = vmax.f32 %v3904_v57, 0.0 }
 0x147   : > { %v1906_v12 = vmax.f32 %v1801_v21, %v1806_v22  ;;  %v3927_v17 = vadd.f32 %v2887_v45, %v3588_v39  ;;  %v3930_v18 = vadd.f32 %v3007_v46, %v3588_v39  ;;  %v1100_v15 = vadd.f32 %v3588_v39, %v1099_v9  ;;  %v2890_v59 = vpop.f32.mrb[44].mxu0 }
 0x148   : > { %v1500_v20 = vadd.f32 %v3588_v39, %v1499_v34  ;;  %v3010_v60 = vpop.f32.mrb[44].mxu1  ;;  %v2044_v23 = vrot.slane %v1866_v11, 1  ;;  %v1728_v16 = vmax.f32 %v1090_v30, 0.0  ;;  %v1808_v48 = vmax.f32 %v1490_v31, 0.0  ;;  %v1109_v26 = vpop.f32.mrb[45].mxu0 }
 0x149   : > { %v2124_v47 = vrot.slane %v1906_v12, 1  ;;  %v1509_v4 = vpop.f32.mrb[45].mxu1  ;;  %v1730_v53 = vmax.f32 %v1100_v15, 0.0  ;;  %v1115_v32 = vadd.f32 %v2890_v59, %v3588_v39  ;;  %v1515_v35 = vadd.f32 %v3010_v60, %v3588_v39 }
 0x14a   : > { %v1810_v24 = vmax.f32 %v1500_v20, 0.0  ;;  %v2045_v36 = vsel %vm2008_vm4, %v2042_v42, %v2044_v23  ;;  %v2047_v37 = vsel %vm2008_vm4, %v2044_v23, %v2046_v49  ;;  %v1110_v3 = vadd.f32 %v3588_v39, %v1109_v26 }
 0x14b   : > { %v2125_v38 = vsel %vm2008_vm4, %v2122_v29, %v2124_v47  ;;  %v2127_v40 = vsel %vm2008_vm4, %v2124_v47, %v2126_v10  ;;  %v2266_v41 = vmax.f32 %v3876_v54, %v2045_v36  ;;  %v2267_v25 = vmax.f32 %v1866_v11, %v2047_v37  ;;  %v2893_v44 = vpop.f32.mrb[46].mxu0 }
 0x14c   : > { %v2306_v43 = vmax.f32 %v3878_v28, %v2125_v38  ;;  %v2307_v42 = vmax.f32 %v1906_v12, %v2127_v40  ;;  %v3013_v6 = vpop.f32.mrb[46].mxu1  ;;  %v1733_v27 = vmax.f32 %v1115_v32, 0.0  ;;  %v1813_v55 = vmax.f32 %v1515_v35, 0.0  ;;  %v1119_v7 = vpop.f32.mrb[47].mxu0 }
 0x14d   : > { %v1510_v29 = vadd.f32 %v3588_v39, %v1509_v4  ;;  %v1519_v56 = vpop.f32.mrb[47].mxu1  ;;  %2347 = vst.msk [vmem:[%s3648_s10 + $0x88] sm:$0xff] %vm2329_vm5, %v2266_v41  ;;  %2348 = vst.msk [vmem:[%s3648_s10 + $0x90] sm:$0xff] %vm2329_vm5, %v2267_v25  ;;  %v1125_v54 = vadd.f32 %v2893_v44, %v3588_v39  ;;  %v1525_v28 = vadd.f32 %v3013_v6, %v3588_v39  ;;  %v1732_v63 = vmax.f32 %v1110_v3, 0.0 }
 0x14e   : > { %2387 = vst.msk [vmem:[%s3648_s10 + $0x1c8] sm:$0xff] %vm2329_vm5, %v2306_v43  ;;  %2388 = vst.msk [vmem:[%s3648_s10 + $0x1d0] sm:$0xff] %vm2329_vm5, %v2307_v42  ;;  %v1120_v57 = vadd.f32 %v3588_v39, %v1119_v7  ;;  %v1520_v58 = vadd.f32 %v3588_v39, %v1519_v56  ;;  %v1868_v61 = vmax.f32 %v1728_v16, %v1733_v27  ;;  %v1811_v3 = vmax.f32 %v3930_v18, 0.0 }
 0x14f   : > { %v1908_v62 = vmax.f32 %v1808_v48, %v1813_v55  ;;  %v1812_v52 = vmax.f32 %v1510_v29, 0.0  ;;  %v1735_v1 = vmax.f32 %v1125_v54, 0.0  ;;  %v1815_v0 = vmax.f32 %v1525_v28, 0.0  ;;  %v2896_v46 = vpop.f32.mrb[48].mxu0 }
 0x150   : > { %v1734_v2 = vmax.f32 %v1120_v57, 0.0  ;;  %v1814_v45 = vmax.f32 %v1520_v58, 0.0  ;;  %v3016_v8 = vpop.f32.mrb[48].mxu1  ;;  %v2048_v21 = vrot.slane %v1868_v61, 1  ;;  %v1135_v22 = vadd.f32 %v2896_v46, %v3588_v39  ;;  %v1129_v34 = vpop.f32.mrb[49].mxu0 }
 0x151   : > { %v2128_v51 = vrot.slane %v1908_v62, 1  ;;  %v1535_v9 = vadd.f32 %v3016_v8, %v3588_v39  ;;  %v1529_v30 = vpop.f32.mrb[49].mxu1  ;;  %v3962_v31 = vmax.f32 %v1730_v53, %v1735_v1  ;;  %v3964_v11 = vmax.f32 %v1810_v24, %v1815_v0 }
 0x152   : > { %v1869_v12 = vmax.f32 %v1729_v13, %v1734_v2  ;;  %v1909_v15 = vmax.f32 %v1809_v14, %v1814_v45  ;;  %v2049_v20 = vsel %vm2008_vm4, %v2046_v49, %v2048_v21  ;;  %v1737_v60 = vmax.f32 %v1135_v22, 0.0 }
 0x153   : > { %v2129_v59 = vsel %vm2008_vm4, %v2126_v10, %v2128_v51  ;;  %v1817_v39 = vmax.f32 %v1535_v9, 0.0  ;;  %v2268_v23 = vmax.f32 %v3890_v33, %v2049_v20  ;;  %v2052_v16 = vrot.slane %v3962_v31, 1  ;;  %v2899_v14 = vpop.f32.mrb[50].mxu0  ;;  %v3987_v33 = vld [vmem:[%s4331_s2] ss:$0 sm:$0xff] }
 0x154   : > { %v2308_v47 = vmax.f32 %v3892_v50, %v2129_v59  ;;  %v2132_v13 = vrot.slane %v3964_v11, 1  ;;  %v3019_v48 = vpop.f32.mrb[50].mxu1  ;;  %v2050_v26 = vrot.slane %v1869_v12, 1  ;;  %v2130_v49 = vrot.slane %v1909_v15, 1  ;;  %v1139_v10 = vpop.f32.mrb[51].mxu0 }
 0x155   : > { %v3976_v4 = vmax.f32 %v1732_v63, %v1737_v60  ;;  %v3978_v53 = vmax.f32 %v1812_v52, %v1817_v39  ;;  %v1539_v24 = vpop.f32.mrb[51].mxu1  ;;  %2349 = vst.msk [vmem:[%s3648_s10 + $0x98] sm:$0xff] %vm2329_vm5, %v2268_v23  ;;  %v1130_v50 = vadd.f32 %v3987_v33, %v1129_v34  ;;  %v1530_v32 = vadd.f32 %v3987_v33, %v1529_v30 }
 0x156   : > { %2389 = vst.msk [vmem:[%s3648_s10 + $0x1d8] sm:$0xff] %vm2329_vm5, %v2308_v47  ;;  %v3992_v35 = vadd.f32 %v3987_v33, %v2899_v14  ;;  %v3995_v36 = vadd.f32 %v3987_v33, %v3019_v48  ;;  %v2051_v37 = vsel %vm2008_vm4, %v2048_v21, %v2050_v26  ;;  %v2053_v38 = vsel %vm2008_vm4, %v2050_v26, %v2052_v16 }
 0x157   : > { %v2131_v40 = vsel %vm2008_vm4, %v2128_v51, %v2130_v49  ;;  %v2133_v41 = vsel %vm2008_vm4, %v2130_v49, %v2132_v13  ;;  %v2269_v25 = vmax.f32 %v1868_v61, %v2051_v37  ;;  %v2270_v43 = vmax.f32 %v1869_v12, %v2053_v38  ;;  %v2902_v6 = vpop.f32.mrb[52].mxu0 }
 0x158   : > { %v2309_v42 = vmax.f32 %v1908_v62, %v2131_v40  ;;  %v2310_v44 = vmax.f32 %v1909_v15, %v2133_v41  ;;  %v3022_v27 = vpop.f32.mrb[52].mxu1  ;;  %v1731_v55 = vmax.f32 %v3927_v17, 0.0  ;;  %v1736_v29 = vmax.f32 %v1130_v50, 0.0  ;;  %v1149_v56 = vpop.f32.mrb[53].mxu0 }
 0x159   : > { %v1816_v7 = vmax.f32 %v1530_v32, 0.0  ;;  %v1549_v54 = vpop.f32.mrb[53].mxu1  ;;  %2350 = vst.msk [vmem:[%s3648_s10 + $0xa0] sm:$0xff] %vm2329_vm5, %v2269_v25  ;;  %2351 = vst.msk [vmem:[%s3648_s10 + $0xa8] sm:$0xff] %vm2329_vm5, %v2270_v43  ;;  %v2056_v28 = vrot.slane %v3976_v4, 1  ;;  %v2136_v57 = vrot.slane %v3978_v53, 1  ;;  %v1140_v17 = vadd.f32 %v3987_v33, %v1139_v10 }
 0x15a   : > { %2390 = vst.msk [vmem:[%s3648_s10 + $0x1e0] sm:$0xff] %vm2329_vm5, %v2309_v42  ;;  %2391 = vst.msk [vmem:[%s3648_s10 + $0x1e8] sm:$0xff] %vm2329_vm5, %v2310_v44  ;;  %v1540_v18 = vadd.f32 %v3987_v33, %v1539_v24  ;;  %v1871_v58 = vmax.f32 %v1731_v55, %v1736_v29  ;;  %v1739_v62 = vmax.f32 %v3992_v35, 0.0  ;;  %v1819_v63 = vmax.f32 %v3995_v36, 0.0 }
 0x15b   : > { %v1911_v61 = vmax.f32 %v1811_v3, %v1816_v7  ;;  %v4020_v52 = vadd.f32 %v3987_v33, %v2902_v6  ;;  %v4023_v1 = vadd.f32 %v3987_v33, %v3022_v27  ;;  %v1150_v0 = vadd.f32 %v3987_v33, %v1149_v56  ;;  %v2905_v45 = vpop.f32.mrb[54].mxu0 }
 0x15c   : > { %v1550_v2 = vadd.f32 %v3987_v33, %v1549_v54  ;;  %v3025_v46 = vpop.f32.mrb[54].mxu1  ;;  %v2054_v8 = vrot.slane %v1871_v58, 1  ;;  %v1738_v51 = vmax.f32 %v1140_v17, 0.0  ;;  %v1818_v22 = vmax.f32 %v1540_v18, 0.0  ;;  %v1159_v9 = vpop.f32.mrb[55].mxu0 }
 0x15d   : > { %v2134_v21 = vrot.slane %v1911_v61, 1  ;;  %v1559_v34 = vpop.f32.mrb[55].mxu1  ;;  %v1740_v30 = vmax.f32 %v1150_v0, 0.0  ;;  %v1165_v15 = vadd.f32 %v3987_v33, %v2905_v45  ;;  %v1565_v20 = vadd.f32 %v3987_v33, %v3025_v46 }
 0x15e   : > { %v1820_v12 = vmax.f32 %v1550_v2, 0.0  ;;  %v2055_v59 = vsel %vm2008_vm4, %v2052_v16, %v2054_v8  ;;  %v2057_v60 = vsel %vm2008_vm4, %v2054_v8, %v2056_v28  ;;  %v1160_v50 = vadd.f32 %v3987_v33, %v1159_v9 }
 0x15f   : > { %v2135_v39 = vsel %vm2008_vm4, %v2132_v13, %v2134_v21  ;;  %v2137_v23 = vsel %vm2008_vm4, %v2134_v21, %v2136_v57  ;;  %v2271_v47 = vmax.f32 %v3962_v31, %v2055_v59  ;;  %v2272_v14 = vmax.f32 %v1871_v58, %v2057_v60  ;;  %v2908_v26 = vpop.f32.mrb[56].mxu0 }
 0x160   : > { %v2311_v16 = vmax.f32 %v3964_v11, %v2135_v39  ;;  %v2312_v48 = vmax.f32 %v1911_v61, %v2137_v23  ;;  %v3028_v49 = vpop.f32.mrb[56].mxu1  ;;  %v1743_v10 = vmax.f32 %v1165_v15, 0.0  ;;  %v1823_v24 = vmax.f32 %v1565_v20, 0.0  ;;  %v1169_v32 = vpop.f32.mrb[57].mxu0 }
 0x161   : > { %v1560_v13 = vadd.f32 %v3987_v33, %v1559_v34  ;;  %v1569_v35 = vpop.f32.mrb[57].mxu1  ;;  %2352 = vst.msk [vmem:[%s3648_s10 + $0xb0] sm:$0xff] %vm2329_vm5, %v2271_v47  ;;  %2353 = vst.msk [vmem:[%s3648_s10 + $0xb8] sm:$0xff] %vm2329_vm5, %v2272_v14  ;;  %v1175_v31 = vadd.f32 %v3987_v33, %v2908_v26  ;;  %v1575_v11 = vadd.f32 %v3987_v33, %v3028_v49  ;;  %v1742_v41 = vmax.f32 %v1160_v50, 0.0 }
 0x162   : > { %2392 = vst.msk [vmem:[%s3648_s10 + $0x1f0] sm:$0xff] %vm2329_vm5, %v2311_v16  ;;  %2393 = vst.msk [vmem:[%s3648_s10 + $0x1f8] sm:$0xff] %vm2329_vm5, %v2312_v48  ;;  %v1170_v36 = vadd.f32 %v3987_v33, %v1169_v32  ;;  %v1570_v37 = vadd.f32 %v3987_v33, %v1569_v35  ;;  %v1873_v38 = vmax.f32 %v1738_v51, %v1743_v10  ;;  %v1821_v50 = vmax.f32 %v4023_v1, 0.0 }
 0x163   : > { %v1913_v40 = vmax.f32 %v1818_v22, %v1823_v24  ;;  %v1822_v25 = vmax.f32 %v1560_v13, 0.0  ;;  %v1745_v43 = vmax.f32 %v1175_v31, 0.0  ;;  %v1825_v42 = vmax.f32 %v1575_v11, 0.0  ;;  %v2911_v27 = vpop.f32.mrb[58].mxu0 }
 0x164   : > { %v1744_v44 = vmax.f32 %v1170_v36, 0.0  ;;  %v1824_v6 = vmax.f32 %v1570_v37, 0.0  ;;  %v3031_v55 = vpop.f32.mrb[58].mxu1  ;;  %v2058_v3 = vrot.slane %v1873_v38, 1  ;;  %v1185_v7 = vadd.f32 %v3987_v33, %v2911_v27  ;;  %v1179_v54 = vpop.f32.mrb[59].mxu0 }
 0x165   : > { %v2138_v29 = vrot.slane %v1913_v40, 1  ;;  %v1585_v56 = vadd.f32 %v3987_v33, %v3031_v55  ;;  %v1579_v17 = vpop.f32.mrb[59].mxu1  ;;  %v4057_v18 = vmax.f32 %v1740_v30, %v1745_v43  ;;  %v4059_v58 = vmax.f32 %v1820_v12, %v1825_v42 }
 0x166   : > { %v1874_v61 = vmax.f32 %v1739_v62, %v1744_v44  ;;  %v1914_v0 = vmax.f32 %v1819_v63, %v1824_v6  ;;  %v2059_v2 = vsel %vm2008_vm4, %v2056_v28, %v2058_v3  ;;  %v1747_v46 = vmax.f32 %v1185_v7, 0.0 }
 0x167   : > { %v2139_v45 = vsel %vm2008_vm4, %v2136_v57, %v2138_v29  ;;  %v1827_v8 = vmax.f32 %v1585_v56, 0.0  ;;  %v2273_v21 = vmax.f32 %v3976_v4, %v2059_v2  ;;  %v2062_v22 = vrot.slane %v4057_v18, 1  ;;  %v2914_v63 = vpop.f32.mrb[60].mxu0 }
 0x168   : > { %v2313_v51 = vmax.f32 %v3978_v53, %v2139_v45  ;;  %v2142_v62 = vrot.slane %v4059_v58, 1  ;;  %v3034_v9 = vpop.f32.mrb[60].mxu1  ;;  %v2060_v34 = vrot.slane %v1874_v61, 1  ;;  %v2140_v28 = vrot.slane %v1914_v0, 1  ;;  %v1189_v57 = vpop.f32.mrb[61].mxu0 }
 0x169   : > { %v4071_v30 = vmax.f32 %v1742_v41, %v1747_v46  ;;  %v4073_v12 = vmax.f32 %v1822_v25, %v1827_v8  ;;  %v1589_v15 = vpop.f32.mrb[61].mxu1  ;;  %2354 = vst.msk [vmem:[%s3648_s10 + $0xc0] sm:$0xff] %vm2329_vm5, %v2273_v21  ;;  %v1180_v4 = vadd.f32 %v3987_v33, %v1179_v54  ;;  %v1580_v53 = vadd.f32 %v3987_v33, %v1579_v17 }
 0x16a   : > { %2394 = vst.msk [vmem:[%s3648_s10 + $0x200] sm:$0xff] %vm2329_vm5, %v2313_v51  ;;  %v4082_v20 = vadd.f32 %v3987_v33, %v2914_v63  ;;  %v4085_v59 = vadd.f32 %v3987_v33, %v3034_v9  ;;  %v2061_v60 = vsel %vm2008_vm4, %v2058_v3, %v2060_v34  ;;  %v2063_v39 = vsel %vm2008_vm4, %v2060_v34, %v2062_v22 }
 0x16b   : > { %v2141_v23 = vsel %vm2008_vm4, %v2138_v29, %v2140_v28  ;;  %v2143_v47 = vsel %vm2008_vm4, %v2140_v28, %v2142_v62  ;;  %v2274_v14 = vmax.f32 %v1873_v38, %v2061_v60  ;;  %v2275_v16 = vmax.f32 %v1874_v61, %v2063_v39  ;;  %v2917_v49 = vpop.f32.mrb[62].mxu0 }
 0x16c   : > { %v2314_v48 = vmax.f32 %v1913_v40, %v2141_v23  ;;  %v2315_v26 = vmax.f32 %v1914_v0, %v2143_v47  ;;  %v3037_v10 = vpop.f32.mrb[62].mxu1  ;;  %v1741_v24 = vmax.f32 %v4020_v52, 0.0  ;;  %v1746_v13 = vmax.f32 %v1180_v4, 0.0  ;;  %v1199_v35 = vpop.f32.mrb[63].mxu0 }
 0x16d   : > { %v1826_v32 = vmax.f32 %v1580_v53, 0.0  ;;  %v1599_v31 = vpop.f32.mrb[63].mxu1  ;;  %2355 = vst.msk [vmem:[%s3648_s10 + $0xc8] sm:$0xff] %vm2329_vm5, %v2274_v14  ;;  %2356 = vst.msk [vmem:[%s3648_s10 + $0xd0] sm:$0xff] %vm2329_vm5, %v2275_v16  ;;  %v2066_v11 = vrot.slane %v4071_v30, 1  ;;  %v2146_v36 = vrot.slane %v4073_v12, 1  ;;  %v1190_v52 = vadd.f32 %v3987_v33, %v1189_v57 }
 0x16e   : > { %2395 = vst.msk [vmem:[%s3648_s10 + $0x208] sm:$0xff] %vm2329_vm5, %v2314_v48  ;;  %2396 = vst.msk [vmem:[%s3648_s10 + $0x210] sm:$0xff] %vm2329_vm5, %v2315_v26  ;;  %v1590_v1 = vadd.f32 %v3987_v33, %v1589_v15  ;;  %v1876_v37 = vmax.f32 %v1741_v24, %v1746_v13  ;;  %v1749_v40 = vmax.f32 %v4082_v20, 0.0  ;;  %v1829_v41 = vmax.f32 %v4085_v59, 0.0 }
 0x16f   : > { %v1916_v38 = vmax.f32 %v1821_v50, %v1826_v32  ;;  %v4108_v25 = vadd.f32 %v3987_v33, %v2917_v49  ;;  %v4111_v43 = vadd.f32 %v3987_v33, %v3037_v10  ;;  %v1200_v42 = vadd.f32 %v3987_v33, %v1199_v35  ;;  %v2920_v6 = vpop.f32.mrb[64].mxu0 }
 0x170   : > { %v1600_v44 = vadd.f32 %v3987_v33, %v1599_v31  ;;  %v3040_v27 = vpop.f32.mrb[64].mxu1  ;;  %v2064_v55 = vrot.slane %v1876_v37, 1  ;;  %v1748_v29 = vmax.f32 %v1190_v52, 0.0  ;;  %v1828_v7 = vmax.f32 %v1590_v1, 0.0  ;;  %v1209_v56 = vpop.f32.mrb[65].mxu0 }
 0x171   : > { %v2144_v3 = vrot.slane %v1916_v38, 1  ;;  %v1609_v54 = vpop.f32.mrb[65].mxu1  ;;  %v1750_v17 = vmax.f32 %v1200_v42, 0.0  ;;  %v1215_v0 = vadd.f32 %v3987_v33, %v2920_v6  ;;  %v1615_v2 = vadd.f32 %v3987_v33, %v3040_v27 }
 0x172   : > { %v1830_v61 = vmax.f32 %v1600_v44, 0.0  ;;  %v2065_v45 = vsel %vm2008_vm4, %v2062_v22, %v2064_v55  ;;  %v2067_v46 = vsel %vm2008_vm4, %v2064_v55, %v2066_v11  ;;  %v1210_v4 = vadd.f32 %v3987_v33, %v1209_v56 }
 0x173   : > { %v2145_v8 = vsel %vm2008_vm4, %v2142_v62, %v2144_v3  ;;  %v2147_v21 = vsel %vm2008_vm4, %v2144_v3, %v2146_v36  ;;  %v2276_v51 = vmax.f32 %v4057_v18, %v2065_v45  ;;  %v2277_v63 = vmax.f32 %v1876_v37, %v2067_v46  ;;  %v2923_v34 = vpop.f32.mrb[66].mxu0 }
 0x174   : > { %v2316_v9 = vmax.f32 %v4059_v58, %v2145_v8  ;;  %v2317_v22 = vmax.f32 %v1916_v38, %v2147_v21  ;;  %v3043_v28 = vpop.f32.mrb[66].mxu1  ;;  %v1753_v57 = vmax.f32 %v1215_v0, 0.0  ;;  %v1833_v15 = vmax.f32 %v1615_v2, 0.0  ;;  %v1219_v53 = vpop.f32.mrb[67].mxu0 }
 0x175   : > { %v1610_v62 = vadd.f32 %v3987_v33, %v1609_v54  ;;  %v1619_v20 = vpop.f32.mrb[67].mxu1  ;;  %2357 = vst.msk [vmem:[%s3648_s10 + $0xd8] sm:$0xff] %vm2329_vm5, %v2276_v51  ;;  %2358 = vst.msk [vmem:[%s3648_s10 + $0xe0] sm:$0xff] %vm2329_vm5, %v2277_v63  ;;  %v1225_v18 = vadd.f32 %v3987_v33, %v2923_v34  ;;  %v1625_v58 = vadd.f32 %v3987_v33, %v3043_v28  ;;  %v1752_v47 = vmax.f32 %v1210_v4, 0.0 }
 0x176   : > { %2397 = vst.msk [vmem:[%s3648_s10 + $0x218] sm:$0xff] %vm2329_vm5, %v2316_v9  ;;  %2398 = vst.msk [vmem:[%s3648_s10 + $0x220] sm:$0xff] %vm2329_vm5, %v2317_v22  ;;  %v1220_v59 = vadd.f32 %v3987_v33, %v1219_v53  ;;  %v1620_v60 = vadd.f32 %v3987_v33, %v1619_v20  ;;  %v1878_v39 = vmax.f32 %v1748_v29, %v1753_v57  ;;  %v1831_v4 = vmax.f32 %v4111_v43, 0.0 }
 0x177   : > { %v1918_v23 = vmax.f32 %v1828_v7, %v1833_v15  ;;  %v1832_v14 = vmax.f32 %v1610_v62, 0.0  ;;  %v1755_v16 = vmax.f32 %v1225_v18, 0.0  ;;  %v1835_v48 = vmax.f32 %v1625_v58, 0.0  ;;  %v2926_v10 = vpop.f32.mrb[68].mxu0 }
 0x178   : > { %v1754_v26 = vmax.f32 %v1220_v59, 0.0  ;;  %v1834_v49 = vmax.f32 %v1620_v60, 0.0  ;;  %v3046_v24 = vpop.f32.mrb[68].mxu1  ;;  %v2068_v50 = vrot.slane %v1878_v39, 1  ;;  %v1235_v32 = vadd.f32 %v3987_v33, %v2926_v10  ;;  %v1229_v31 = vpop.f32.mrb[69].mxu0 }
 0x179   : > { %v2148_v13 = vrot.slane %v1918_v23, 1  ;;  %v1635_v35 = vadd.f32 %v3987_v33, %v3046_v24  ;;  %v1629_v52 = vpop.f32.mrb[69].mxu1  ;;  %v4143_v1 = vmax.f32 %v1750_v17, %v1755_v16  ;;  %v4145_v37 = vmax.f32 %v1830_v61, %v1835_v48 }
 0x17a   : > { %v1879_v38 = vmax.f32 %v1749_v40, %v1754_v26  ;;  %v1919_v42 = vmax.f32 %v1829_v41, %v1834_v49  ;;  %v2069_v44 = vsel %vm2008_vm4, %v2066_v11, %v2068_v50  ;;  %v1757_v27 = vmax.f32 %v1235_v32, 0.0 }
 0x17b   : > { %v2149_v6 = vsel %vm2008_vm4, %v2146_v36, %v2148_v13  ;;  %v1837_v55 = vmax.f32 %v1635_v35, 0.0  ;;  %v2278_v3 = vmax.f32 %v4071_v30, %v2069_v44  ;;  %v2072_v7 = vrot.slane %v4143_v1, 1  ;;  %v2929_v41 = vpop.f32.mrb[70].mxu0 }
 0x17c   : > { %v2318_v29 = vmax.f32 %v4073_v12, %v2149_v6  ;;  %v2152_v40 = vrot.slane %v4145_v37, 1  ;;  %v3049_v56 = vpop.f32.mrb[70].mxu1  ;;  %v2070_v54 = vrot.slane %v1879_v38, 1  ;;  %v2150_v11 = vrot.slane %v1919_v42, 1  ;;  %v1239_v36 = vpop.f32.mrb[71].mxu0 }
 0x17d   : > { %v4157_v17 = vmax.f32 %v1752_v47, %v1757_v27  ;;  %v4159_v61 = vmax.f32 %v1832_v14, %v1837_v55  ;;  %v1639_v0 = vpop.f32.mrb[71].mxu1  ;;  %2359 = vst.msk [vmem:[%s3648_s10 + $0xe8] sm:$0xff] %vm2329_vm5, %v2278_v3  ;;  %v1230_v30 = vadd.f32 %v3987_v33, %v1229_v31  ;;  %v1630_v12 = vadd.f32 %v3987_v33, %v1629_v52 }
 0x17e   : > { %2399 = vst.msk [vmem:[%s3648_s10 + $0x228] sm:$0xff] %vm2329_vm5, %v2318_v29  ;;  %v4168_v2 = vadd.f32 %v3987_v33, %v2929_v41  ;;  %v4171_v45 = vadd.f32 %v3987_v33, %v3049_v56  ;;  %v2071_v46 = vsel %vm2008_vm4, %v2068_v50, %v2070_v54  ;;  %v2073_v8 = vsel %vm2008_vm4, %v2070_v54, %v2072_v7 }
 0x17f   : > { %v2151_v21 = vsel %vm2008_vm4, %v2148_v13, %v2150_v11  ;;  %v2153_v51 = vsel %vm2008_vm4, %v2150_v11, %v2152_v40  ;;  %v2279_v63 = vmax.f32 %v1878_v39, %v2071_v46  ;;  %v2280_v9 = vmax.f32 %v1879_v38, %v2073_v8  ;;  %v2932_v28 = vpop.f32.mrb[72].mxu0 }
 0x180   : > { %v2319_v22 = vmax.f32 %v1918_v23, %v2151_v21  ;;  %v2320_v34 = vmax.f32 %v1919_v42, %v2153_v51  ;;  %v3052_v57 = vpop.f32.mrb[72].mxu1  ;;  %v1751_v15 = vmax.f32 %v4108_v25, 0.0  ;;  %v1756_v62 = vmax.f32 %v1230_v30, 0.0  ;;  %v1249_v20 = vpop.f32.mrb[73].mxu0 }
 0x181   : > { %v1836_v53 = vmax.f32 %v1630_v12, 0.0  ;;  %v1649_v18 = vpop.f32.mrb[73].mxu1  ;;  %2360 = vst.msk [vmem:[%s3648_s10 + $0xf0] sm:$0xff] %vm2329_vm5, %v2279_v63  ;;  %2361 = vst.msk [vmem:[%s3648_s10 + $0xf8] sm:$0xff] %vm2329_vm5, %v2280_v9  ;;  %v2076_v58 = vrot.slane %v4157_v17, 1  ;;  %v2156_v59 = vrot.slane %v4159_v61, 1  ;;  %v1240_v25 = vadd.f32 %v3987_v33, %v1239_v36 }
 0x182   : > { %2400 = vst.msk [vmem:[%s3648_s10 + $0x230] sm:$0xff] %vm2329_vm5, %v2319_v22  ;;  %2401 = vst.msk [vmem:[%s3648_s10 + $0x238] sm:$0xff] %vm2329_vm5, %v2320_v34  ;;  %v1640_v43 = vadd.f32 %v3987_v33, %v1639_v0  ;;  %v1881_v60 = vmax.f32 %v1751_v15, %v1756_v62  ;;  %v1759_v23 = vmax.f32 %v4168_v2, 0.0  ;;  %v1839_v47 = vmax.f32 %v4171_v45, 0.0 }
 0x183   : > { %v1921_v39 = vmax.f32 %v1831_v4, %v1836_v53  ;;  %v4194_v14 = vadd.f32 %v3987_v33, %v2932_v28  ;;  %v4197_v16 = vadd.f32 %v3987_v33, %v3052_v57  ;;  %v1250_v48 = vadd.f32 %v3987_v33, %v1249_v20  ;;  %v2935_v49 = vpop.f32.mrb[74].mxu0 }
 0x184   : > { %v1650_v26 = vadd.f32 %v3987_v33, %v1649_v18  ;;  %v3055_v10 = vpop.f32.mrb[74].mxu1  ;;  %v2074_v24 = vrot.slane %v1881_v60, 1  ;;  %v1758_v13 = vmax.f32 %v1240_v25, 0.0  ;;  %v1838_v32 = vmax.f32 %v1640_v43, 0.0  ;;  %v1259_v35 = vpop.f32.mrb[75].mxu0 }
 0x185   : > { %v2154_v50 = vrot.slane %v1921_v39, 1  ;;  %v1659_v31 = vpop.f32.mrb[75].mxu1  ;;  %v1760_v52 = vmax.f32 %v1250_v48, 0.0  ;;  %v1265_v42 = vadd.f32 %v3987_v33, %v2935_v49  ;;  %v1665_v44 = vadd.f32 %v3987_v33, %v3055_v10 }
 0x186   : > { %v1840_v38 = vmax.f32 %v1650_v26, 0.0  ;;  %v2075_v6 = vsel %vm2008_vm4, %v2072_v7, %v2074_v24  ;;  %v2077_v27 = vsel %vm2008_vm4, %v2074_v24, %v2076_v58  ;;  %v1260_v30 = vadd.f32 %v3987_v33, %v1259_v35 }
 0x187   : > { %v2155_v55 = vsel %vm2008_vm4, %v2152_v40, %v2154_v50  ;;  %v2157_v3 = vsel %vm2008_vm4, %v2154_v50, %v2156_v59  ;;  %v2281_v29 = vmax.f32 %v4143_v1, %v2075_v6  ;;  %v2282_v41 = vmax.f32 %v1881_v60, %v2077_v27  ;;  %v2938_v54 = vpop.f32.mrb[76].mxu0 }
 0x188   : > { %v2321_v56 = vmax.f32 %v4145_v37, %v2155_v55  ;;  %v2322_v7 = vmax.f32 %v1921_v39, %v2157_v3  ;;  %v3058_v11 = vpop.f32.mrb[76].mxu1  ;;  %v1763_v36 = vmax.f32 %v1265_v42, 0.0  ;;  %v1843_v0 = vmax.f32 %v1665_v44, 0.0  ;;  %v1269_v12 = vpop.f32.mrb[77].mxu0 }
 0x189   : > { %v1660_v40 = vadd.f32 %v3987_v33, %v1659_v31  ;;  %v1669_v2 = vpop.f32.mrb[77].mxu1  ;;  %2362 = vst.msk [vmem:[%s3648_s10 + $0x100] sm:$0xff] %vm2329_vm5, %v2281_v29  ;;  %2363 = vst.msk [vmem:[%s3648_s10 + $0x108] sm:$0xff] %vm2329_vm5, %v2282_v41  ;;  %v1275_v1 = vadd.f32 %v3987_v33, %v2938_v54  ;;  %v1675_v37 = vadd.f32 %v3987_v33, %v3058_v11  ;;  %v1762_v51 = vmax.f32 %v1260_v30, 0.0 }
 0x18a   : > { %2402 = vst.msk [vmem:[%s3648_s10 + $0x240] sm:$0xff] %vm2329_vm5, %v2321_v56  ;;  %2403 = vst.msk [vmem:[%s3648_s10 + $0x248] sm:$0xff] %vm2329_vm5, %v2322_v7  ;;  %v1270_v45 = vadd.f32 %v3987_v33, %v1269_v12  ;;  %v1670_v46 = vadd.f32 %v3987_v33, %v1669_v2  ;;  %v1883_v8 = vmax.f32 %v1758_v13, %v1763_v36 }
 0x18b   : > { %v1923_v21 = vmax.f32 %v1838_v32, %v1843_v0  ;;  %v1842_v63 = vmax.f32 %v1660_v40, 0.0  ;;  %v1765_v9 = vmax.f32 %v1275_v1, 0.0  ;;  %v1845_v22 = vmax.f32 %v1675_v37, 0.0  ;;  %v2941_v57 = vpop.f32.mrb[78].mxu0 }
 0x18c   : > { %v1764_v34 = vmax.f32 %v1270_v45, 0.0  ;;  %v1844_v28 = vmax.f32 %v1670_v46, 0.0  ;;  %v3061_v15 = vpop.f32.mrb[78].mxu1  ;;  %v2078_v4 = vrot.slane %v1883_v8, 1  ;;  %v1285_v53 = vadd.f32 %v3987_v33, %v2941_v57  ;;  %v1279_v18 = vpop.f32.mrb[79].mxu0 }
 0x18d   : > { %v2158_v62 = vrot.slane %v1923_v21, 1  ;;  %v1685_v20 = vadd.f32 %v3987_v33, %v3061_v15  ;;  %v1679_v25 = vpop.f32.mrb[79].mxu1  ;;  %v1885_v43 = vmax.f32 %v1760_v52, %v1765_v9  ;;  %v1925_v60 = vmax.f32 %v1840_v38, %v1845_v22 }
 0x18e   : > { %v1884_v39 = vmax.f32 %v1759_v23, %v1764_v34  ;;  %v1924_v48 = vmax.f32 %v1839_v47, %v1844_v28  ;;  %v2079_v26 = vsel %vm2008_vm4, %v2076_v58, %v2078_v4  ;;  %v1767_v10 = vmax.f32 %v1285_v53, 0.0 }
 0x18f   : > { %v2159_v49 = vsel %vm2008_vm4, %v2156_v59, %v2158_v62  ;;  %v1847_v24 = vmax.f32 %v1685_v20, 0.0  ;;  %v2283_v50 = vmax.f32 %v4157_v17, %v2079_v26  ;;  %v2082_v32 = vrot.slane %v1885_v43, 1 }
 0x190   : > { %v2323_v13 = vmax.f32 %v4159_v61, %v2159_v49  ;;  %v2162_v35 = vrot.slane %v1925_v60, 1  ;;  %v2080_v23 = vrot.slane %v1884_v39, 1  ;;  %v2160_v31 = vrot.slane %v1924_v48, 1 }
 0x191   : > { %v1887_v47 = vmax.f32 %v1762_v51, %v1767_v10  ;;  %v1927_v52 = vmax.f32 %v1842_v63, %v1847_v24  ;;  %v1761_v38 = vmax.f32 %v4194_v14, 0.0  ;;  %v1841_v58 = vmax.f32 %v4197_v16, 0.0  ;;  %2364 = vst.msk [vmem:[%s3648_s10 + $0x110] sm:$0xff] %vm2329_vm5, %v2283_v50 }
 0x192   : > { %2404 = vst.msk [vmem:[%s3648_s10 + $0x250] sm:$0xff] %vm2329_vm5, %v2323_v13  ;;  %v1280_v17 = vadd.f32 %v3987_v33, %v1279_v18  ;;  %v1680_v61 = vadd.f32 %v3987_v33, %v1679_v25  ;;  %v2081_v59 = vsel %vm2008_vm4, %v2078_v4, %v2080_v23  ;;  %v2083_v42 = vsel %vm2008_vm4, %v2080_v23, %v2082_v32 }
 0x193   : > { %v2161_v14 = vsel %vm2008_vm4, %v2158_v62, %v2160_v31  ;;  %v2163_v16 = vsel %vm2008_vm4, %v2160_v31, %v2162_v35  ;;  %v2284_v44 = vmax.f32 %v1883_v8, %v2081_v59  ;;  %v2285_v6 = vmax.f32 %v1884_v39, %v2083_v42 }
 0x194   : > { %v2324_v27 = vmax.f32 %v1923_v21, %v2161_v14  ;;  %v2325_v55 = vmax.f32 %v1924_v48, %v2163_v16  ;;  %v2086_v3 = vrot.slane %v1887_v47, 1  ;;  %v2166_v29 = vrot.slane %v1927_v52, 1 }
 0x195   : > { %v1766_v41 = vmax.f32 %v1280_v17, 0.0  ;;  %v1846_v33 = vmax.f32 %v1680_v61, 0.0  ;;  %2365 = vst.msk [vmem:[%s3648_s10 + $0x118] sm:$0xff] %vm2329_vm5, %v2284_v44  ;;  %2366 = vst.msk [vmem:[%s3648_s10 + $0x120] sm:$0xff] %vm2329_vm5, %v2285_v6 }
 0x196   : > { %2405 = vst.msk [vmem:[%s3648_s10 + $0x258] sm:$0xff] %vm2329_vm5, %v2324_v27  ;;  %2406 = vst.msk [vmem:[%s3648_s10 + $0x260] sm:$0xff] %vm2329_vm5, %v2325_v55  ;;  %v2089_v56 = vsel %vm2008_vm4, %v2086_v3, %v2088_v19  ;;  %v2248_v7 = vsel %vm2008_vm4, %v2166_v29, 0.0 }
 0x197   : > { %v1886_v54 = vmax.f32 %v1761_v38, %v1766_v41  ;;  %v1926_v11 = vmax.f32 %v1841_v58, %v1846_v33  ;;  %v2288_v36 = vmax.f32 %v1887_v47, %v2089_v56  ;;  %v2328_v0 = vmax.f32 %v1927_v52, %v2248_v7 }
 0x199   : > { %v2084_v30 = vrot.slane %v1886_v54, 1  ;;  %v2164_v40 = vrot.slane %v1926_v11, 1  ;;  %2369 = vst.msk [vmem:[%s3648_s10 + $0x138] sm:$0xff] %vm2329_vm5, %v2288_v36  ;;  %2409 = vst.msk [vmem:[%s3648_s10 + $0x278] sm:$0xff] %vm2329_vm5, %v2328_v0 }
 0x19b   : > { %v2085_v5 = vsel %vm2008_vm4, %v2082_v32, %v2084_v30  ;;  %v2087_v19 = vsel %vm2008_vm4, %v2084_v30, %v2086_v3  ;;  %v2165_v12 = vsel %vm2008_vm4, %v2162_v35, %v2164_v40  ;;  %v2167_v2 = vsel %vm2008_vm4, %v2164_v40, %v2166_v29 }
 0x19c   : > { %v2286_v1 = vmax.f32 %v1885_v43, %v2085_v5  ;;  %v2287_v37 = vmax.f32 %v1886_v54, %v2087_v19  ;;  %v2326_v45 = vmax.f32 %v1925_v60, %v2165_v12  ;;  %v2327_v46 = vmax.f32 %v1926_v11, %v2167_v2 }
 0x19e   : > { %2367 = vst.msk [vmem:[%s3648_s10 + $0x128] sm:$0xff] %vm2329_vm5, %v2286_v1  ;;  %2368 = vst.msk [vmem:[%s3648_s10 + $0x130] sm:$0xff] %vm2329_vm5, %v2287_v37 }
 0x19f   : > { %2407 = vst.msk [vmem:[%s3648_s10 + $0x268] sm:$0xff] %vm2329_vm5, %v2326_v45  ;;  %2408 = vst.msk [vmem:[%s3648_s10 + $0x270] sm:$0xff] %vm2329_vm5, %v2327_v46 }
 0x1a0   : > { %3129 = shalt.err (!%p3126_p3)
}
 0x1a1   : > { %s3130_s4 = scalar_lea.hbm %s4274_s25, 10240  ;;  %s3134_s7 = scalar_lea.hbm %s4332_s3, 20480 }
 0x1a2   : > { %p3131_p4 = scmp.ne.s32.totalorder %s4274_s25, %s3130_s4  ;;  %p3135_p9 = scmp.lt.u32.totalorder %s4274_s25, %s4332_s3 }
 0x1a3   : > { %p3136_p10 = scmp.lt.u32.totalorder %s3134_s7, %s3130_s4  ;;  %p3138_p12 = scmp.lt.u32.totalorder %s3130_s4, %s4274_s25 }
 0x1a4   : > { %p3132_p7 = pnand %p3131_p4, %p3242_p5 }
 0x1a5   : > { %p3137_p11 = por %p3136_p10, %p3135_p9 }
 0x1a6   : > { %p3133_p8 = pneg %p3132_p7 }
 0x1a7   : > { %p3139_p13 = por %p3138_p12, %p3137_p11 }
 0x1a9   : > { %p3140_p0 = pnand %p3139_p13, %p3133_p8 }
 0x1ab   : > { %3143 = shalt.err (!%p3140_p0)
}
 0x1ac   : > { %s3182_s10 = smov 128   ;;  %s3183_s11 = smov 8  }
 0x1ad   : > { %3073 = dma.vmem_to_hbm [thread:$0]  (%p3242_p5), %s4276_s20, 10240, %s4274_s25, %s4288_s26, %s3182_s10, %s3182_s10, %s3183_s11  }
 0x1ae PF: > { %p3079_p1 = scmp.ge.s32.totalorder %s3178_s15, 2  ;;  %s2439_s17 = sand.u32 1, %s3166_s12  }
 0x1af   : > { %s2440_s19 = scalar_lea.sflag [#allocation3], %s2439_s17 }
 0x1b0   : > { %p3076_p2 = pnand %p3079_p1, %p3246_p6 }
 0x1b2   : > { %3161 = dma.done.wait (!%p3076_p2), %s2440_s19, 10240  }
 0x1b3   : > { %3163 = vsyncadd (!%p3076_p2), %s2440_s19, 4294957056  ;;  %p13_p3 = scmp.ge.s32.totalorder %s3229_s18, 4   ;;  %s4335_s12 = smov %s3170_s13 }
 0x1b4   : > { %s4336_s13 = smov %s3174_s14  ;;  %s4337_s14 = smov %s3240_s21 }
 0x1b5   : > { %s4338_s15 = smov %s3229_s18  ;;  %15 = sbr.rel (!%p13_p3) target bundleno = 3 (0x3), region = 67 }
 0x1bc   :  { %2445 = vsyncpa [#allocation3], 1 }
 0x1bd   :  { %2447 = vsyncpa [#allocation3 + $0x1], 1 }

</bundles_post_ra>
